<compile_context>
chip_gen: v5e
topology: v5e:2x2
jax: 0.10.0
libtpu: 0.0.40
codegen_flags: <defaults>
</compile_context>

<pallas_src>
import functools

import numpy as np

import jax
import jax.numpy as jnp
from jax.experimental import pallas as pl
from jax.experimental.pallas import tpu as pltpu

C = 5          # logical in/out channels of both convs
CP = 8         # channels padded to a full sublane group (ch 5 = ones/bias, 6-7 = zero)
K = 20         # conv kernel width
POOL_OUT = 5   # AdaptiveAvgPool1d target length


def _round_up(x, m):
    return ((x + m - 1) // m) * m


def _audio_encoder_kernel(x_ref, w1_ref, w2_ref, pool_ref, o_ref, *, bn, seq_len):
    """One grid step processes bn batch elements folded into the lane axis.

    x_ref   : (1, CP, W_pad)   slab, columns [b*L + l] for l in [0, L), zero tail pad
    w{1,2}  : (CP, K*CP)       flattened conv weights, column = k*CP + i (bias folded)
    pool_ref: (L, POOL_OUT)    per-sample adaptive-avg-pool matrix (zero rows >= L2)
    o_ref   : (1, bn*CP, POOL_OUT)  row = b*CP + c
    """
    L = seq_len
    Wc = bn * L                 # columns we care about
    Wh1 = Wc + (K - 1)          # conv1 output width needed so conv2 windows stay in-bounds

    xs = x_ref[0]               # (CP, W_pad) f32
    w1 = w1_ref[...]
    w2 = w2_ref[...]

    # conv1: batched im2col (20 lane-shifted, 8-sublane-aligned chunks) + ONE matmul.
    im1 = jnp.concatenate([xs[:, k:k + Wh1] for k in range(K)], axis=0)    # (K*CP, Wh1)
    h1 = jnp.dot(w1, im1, preferred_element_type=jnp.float32)              # (CP, Wh1)

    # conv2: same trick on the conv1 output.
    im2 = jnp.concatenate([h1[:, k:k + Wc] for k in range(K)], axis=0)     # (K*CP, Wc)
    h2 = jnp.dot(w2, im2, preferred_element_type=jnp.float32)              # (CP, Wc)

    # Adaptive avg pool: fold batch into sublanes -> (bn*CP, L), then one matmul
    # against the per-sample pool matrix (its rows >= L2 are zero, so the
    # contaminated tail of each segment never contributes).
    h2_rows = jnp.concatenate([h2[:, b * L:(b + 1) * L] for b in range(bn)], axis=0)
    pooled = jnp.dot(h2_rows, pool_ref[...], preferred_element_type=jnp.float32)

    o_ref[0] = pooled.astype(o_ref.dtype)


def _adaptive_pool_matrix(l_valid, l_total, out_size):
    """(l_total, out_size) matrix reproducing torch AdaptiveAvgPool1d on length l_valid."""
    p = np.zeros((l_total, out_size), dtype=np.float32)
    for i in range(out_size):
        s = (i * l_valid) // out_size
        e = -((-(i + 1) * l_valid) // out_size)     # ceil((i+1)*l_valid/out_size)
        p[s:e, i] = 1.0 / float(e - s)
    return p


def _prep_weight(w, b):
    """(C, C, K) weight + (C,) bias -> (CP, K*CP) with column index k*CP + i.

    Bias is folded via the all-ones padded input channel (index C) at tap k=0;
    row C propagates that ones channel so the second conv's bias works the same way.
    """
    w_perm = jnp.transpose(w.astype(jnp.float32), (0, 2, 1))                # (C, K, C)
    w_pad = jnp.pad(w_perm, ((0, CP - C), (0, 0), (0, CP - C)))             # (CP, K, CP)
    wf = w_pad.reshape(CP, K * CP)
    wf = wf.at[:C, C].set(b.astype(jnp.float32))    # bias -> column (k=0, i=C)
    wf = wf.at[C, C].set(1.0)                       # keep ones channel alive
    return wf


def _pick_bn(n, seq_len):
    """Block batch size: grid -> 1 on single-TC chips, 2 parallel blocks on v7x."""
    try:
        kind = jax.devices()[0].device_kind.lower()
    except Exception:
        kind = ""
    num_tc = 2 if "v7" in kind else 1               # v7x: 2 TensorCores; v5e/v6e: 1
    blocks = num_tc if n >= num_tc else 1
    bn = int(pl.cdiv(n, blocks))
    # VMEM guard: two f32 im2col slabs per sample ~ 2*K*CP*L*4 bytes.
    per_sample = 2 * K * CP * seq_len * 4
    cap = max(1, (8 * 1024 * 1024) // per_sample)
    return max(1, min(bn, cap, n))


def audio_encoder_cmumosi(x, w1, b1, w2, b2, *, bn=None):
    """x: (N, 5, L) -> (N, 5, 5). Matches the PyTorch module's forward pass."""
    N, Cin, L = x.shape
    assert Cin == C and L >= 2 * (K - 1) + 1
    L2 = L - 2 * (K - 1)

    if bn is None:
        bn = _pick_bn(N, L)
    bn = int(max(1, min(bn, N)))
    num_blocks = int(pl.cdiv(N, bn))
    n_pad = num_blocks * bn

    xf = x.astype(jnp.float32)
    if n_pad != N:
        xf = jnp.pad(xf, ((0, n_pad - N), (0, 0), (0, 0)))

    # Channel pad 5 -> 8: channel 5 is all ones (carries the biases through the
    # matmuls), channels 6-7 are zero.
    ones_ch = jnp.ones((n_pad, 1, L), jnp.float32)
    zero_ch = jnp.zeros((n_pad, CP - C - 1, L), jnp.float32)
    xp = jnp.concatenate([xf, ones_ch, zero_ch], axis=1)                    # (n_pad, CP, L)

    # Fold batch into the lane axis per block: (num_blocks, CP, bn*L), column b*L + l,
    # then zero-pad lanes so every shifted im2col window stays in-bounds.
    xp = (xp.reshape(num_blocks, bn, CP, L)
            .transpose(0, 2, 1, 3)
            .reshape(num_blocks, CP, bn * L))
    Wc = bn * L
    W_pad = _round_up(Wc + 2 * (K - 1), 128)
    slab = jnp.pad(xp, ((0, 0), (0, 0), (0, W_pad - Wc)))

    w1f = _prep_weight(w1, b1)
    w2f = _prep_weight(w2, b2)
    pool = jnp.asarray(_adaptive_pool_matrix(L2, L, POOL_OUT))              # (L, 5)

    kernel = functools.partial(_audio_encoder_kernel, bn=bn, seq_len=L)

    out_rows = pl.pallas_call(
        kernel,
        out_shape=jax.ShapeDtypeStruct((num_blocks, bn * CP, POOL_OUT), x.dtype),
        grid_spec=pltpu.PrefetchScalarGridSpec(
            num_scalar_prefetch=0,
            grid=(num_blocks,),
            in_specs=[
                pl.BlockSpec((1, CP, W_pad), lambda n: (n, 0, 0)),
                pl.BlockSpec((CP, K * CP), lambda n: (0, 0)),
                pl.BlockSpec((CP, K * CP), lambda n: (0, 0)),
                pl.BlockSpec((L, POOL_OUT), lambda n: (0, 0)),
            ],
            out_specs=pl.BlockSpec((1, bn * CP, POOL_OUT), lambda n: (n, 0, 0)),
        ),
        compiler_params=pltpu.CompilerParams(
            dimension_semantics=("parallel",),
        ),
    )(slab, w1f, w2f, pool)

    # (num_blocks, bn*CP, 5) rows are ordered b*CP + c -> (n_pad, CP, 5) -> crop pads.
    out = out_rows.reshape(n_pad, CP, POOL_OUT)[:N, :C, :]
    return out


def _reference(x, w1, b1, w2, b2):
    """Pure-JAX/XLA reference (lax conv + manual adaptive pool)."""
    dn = jax.lax.conv_dimension_numbers(x.shape, w1.shape, ("NCH", "OIH", "NCH"))
    h = jax.lax.conv_general_dilated(x, w1, (1,), "VALID", dimension_numbers=dn)
    h = h + b1[None, :, None]
    h = jax.lax.conv_general_dilated(h, w2, (1,), "VALID", dimension_numbers=dn)
    h = h + b2[None, :, None]
    L = h.shape[-1]
    cols = []
    for i in range(POOL_OUT):
        s = (i * L) // POOL_OUT
        e = -((-(i + 1) * L) // POOL_OUT)
        cols.append(jnp.mean(h[:, :, s:e], axis=-1, keepdims=True))
    return jnp.concatenate(cols, axis=-1)


if __name__ == "__main__":
    key = jax.random.PRNGKey(0)
    k_x, k_w1, k_b1, k_w2, k_b2 = jax.random.split(key, 5)

    # Small but representative: N=16, L=64 -> conv outputs 45 and 26, pooled to 5.
    N, L = 16, 64
    x = jax.random.normal(k_x, (N, C, L), dtype=jnp.float32)

    # Deterministic parameter init (PyTorch-style uniform bound 1/sqrt(C*K)).
    bound = 1.0 / np.sqrt(C * K)
    w1 = jax.random.uniform(k_w1, (C, C, K), jnp.float32, -bound, bound)
    b1 = jax.random.uniform(k_b1, (C,), jnp.float32, -bound, bound)
    w2 = jax.random.uniform(k_w2, (C, C, K), jnp.float32, -bound, bound)
    b2 = jax.random.uniform(k_b2, (C,), jnp.float32, -bound, bound)

    out = audio_encoder_cmumosi(x, w1, b1, w2, b2)
    out = jax.block_until_ready(out)

    ref = jax.block_until_ready(_reference(x, w1, b1, w2, b2))
    assert out.shape == (N, C, POOL_OUT), out.shape
    np.testing.assert_allclose(np.asarray(out), np.asarray(ref), rtol=1e-4, atol=1e-4)

    print("KERNEL_OK")
</pallas_src>

<mosaic_0001>
module attributes {stable_mosaic.version = 11 : i64} {
  func.func @_audio_encoder_kernel(%arg0: i32, %arg1: memref<1x8x1152xf32, #tpu.memory_space<vmem>>, %arg2: memref<8x160xf32, #tpu.memory_space<vmem>>, %arg3: memref<8x160xf32, #tpu.memory_space<vmem>>, %arg4: memref<64x5xf32, #tpu.memory_space<vmem>>, %arg5: memref<1x128x5xf32, #tpu.memory_space<vmem>>) attributes {dimension_semantics = [#tpu.dimension_semantics<parallel>], iteration_bounds = array<i64: 1>, scalar_prefetch = 0 : i64, scratch_operands = 0 : i64, tpu.core_type = #tpu.core_type<tc>, window_params = [{transform_indices = @transform_0, window_bounds = array<i64: 1, 8, 1152>}, {pipeline_mode = #tpu.pipeline_mode<synchronous>, transform_indices = @transform_1, window_bounds = array<i64: 8, 160>}, {pipeline_mode = #tpu.pipeline_mode<synchronous>, transform_indices = @transform_2, window_bounds = array<i64: 8, 160>}, {pipeline_mode = #tpu.pipeline_mode<synchronous>, transform_indices = @transform_3, window_bounds = array<i64: 64, 5>}, {transform_indices = @transform_4, window_bounds = array<i64: 1, 128, 5>}]} {
    %c0 = arith.constant 0 : index
    %c0_0 = arith.constant 0 : index
    %c0_1 = arith.constant 0 : index
    %0 = vector.load %arg1[%c0, %c0_0, %c0_1] : memref<1x8x1152xf32, #tpu.memory_space<vmem>>, vector<1x8x1152xf32>
    %1 = vector.shape_cast %0 : vector<1x8x1152xf32> to vector<8x1152xf32>
    %c0_2 = arith.constant 0 : index
    %c0_3 = arith.constant 0 : index
    %2 = vector.load %arg2[%c0_2, %c0_3] : memref<8x160xf32, #tpu.memory_space<vmem>>, vector<8x160xf32>
    %c0_4 = arith.constant 0 : index
    %c0_5 = arith.constant 0 : index
    %3 = vector.load %arg3[%c0_4, %c0_5] : memref<8x160xf32, #tpu.memory_space<vmem>>, vector<8x160xf32>
    %4 = vector.extract_strided_slice %1 {offsets = [0, 0], sizes = [8, 1043], strides = [1, 1]} : vector<8x1152xf32> to vector<8x1043xf32>
    %5 = vector.extract_strided_slice %1 {offsets = [0, 1], sizes = [8, 1043], strides = [1, 1]} : vector<8x1152xf32> to vector<8x1043xf32>
    %6 = vector.extract_strided_slice %1 {offsets = [0, 2], sizes = [8, 1043], strides = [1, 1]} : vector<8x1152xf32> to vector<8x1043xf32>
    %7 = vector.extract_strided_slice %1 {offsets = [0, 3], sizes = [8, 1043], strides = [1, 1]} : vector<8x1152xf32> to vector<8x1043xf32>
    %8 = vector.extract_strided_slice %1 {offsets = [0, 4], sizes = [8, 1043], strides = [1, 1]} : vector<8x1152xf32> to vector<8x1043xf32>
    %9 = vector.extract_strided_slice %1 {offsets = [0, 5], sizes = [8, 1043], strides = [1, 1]} : vector<8x1152xf32> to vector<8x1043xf32>
    %10 = vector.extract_strided_slice %1 {offsets = [0, 6], sizes = [8, 1043], strides = [1, 1]} : vector<8x1152xf32> to vector<8x1043xf32>
    %11 = vector.extract_strided_slice %1 {offsets = [0, 7], sizes = [8, 1043], strides = [1, 1]} : vector<8x1152xf32> to vector<8x1043xf32>
    %12 = vector.extract_strided_slice %1 {offsets = [0, 8], sizes = [8, 1043], strides = [1, 1]} : vector<8x1152xf32> to vector<8x1043xf32>
    %13 = vector.extract_strided_slice %1 {offsets = [0, 9], sizes = [8, 1043], strides = [1, 1]} : vector<8x1152xf32> to vector<8x1043xf32>
    %14 = vector.extract_strided_slice %1 {offsets = [0, 10], sizes = [8, 1043], strides = [1, 1]} : vector<8x1152xf32> to vector<8x1043xf32>
    %15 = vector.extract_strided_slice %1 {offsets = [0, 11], sizes = [8, 1043], strides = [1, 1]} : vector<8x1152xf32> to vector<8x1043xf32>
    %16 = vector.extract_strided_slice %1 {offsets = [0, 12], sizes = [8, 1043], strides = [1, 1]} : vector<8x1152xf32> to vector<8x1043xf32>
    %17 = vector.extract_strided_slice %1 {offsets = [0, 13], sizes = [8, 1043], strides = [1, 1]} : vector<8x1152xf32> to vector<8x1043xf32>
    %18 = vector.extract_strided_slice %1 {offsets = [0, 14], sizes = [8, 1043], strides = [1, 1]} : vector<8x1152xf32> to vector<8x1043xf32>
    %19 = vector.extract_strided_slice %1 {offsets = [0, 15], sizes = [8, 1043], strides = [1, 1]} : vector<8x1152xf32> to vector<8x1043xf32>
    %20 = vector.extract_strided_slice %1 {offsets = [0, 16], sizes = [8, 1043], strides = [1, 1]} : vector<8x1152xf32> to vector<8x1043xf32>
    %21 = vector.extract_strided_slice %1 {offsets = [0, 17], sizes = [8, 1043], strides = [1, 1]} : vector<8x1152xf32> to vector<8x1043xf32>
    %22 = vector.extract_strided_slice %1 {offsets = [0, 18], sizes = [8, 1043], strides = [1, 1]} : vector<8x1152xf32> to vector<8x1043xf32>
    %23 = vector.extract_strided_slice %1 {offsets = [0, 19], sizes = [8, 1043], strides = [1, 1]} : vector<8x1152xf32> to vector<8x1043xf32>
    %24 = tpu.concatenate %4, %5, %6, %7, %8, %9, %10, %11, %12, %13, %14, %15, %16, %17, %18, %19 in 0 : vector<8x1043xf32>, vector<8x1043xf32>, vector<8x1043xf32>, vector<8x1043xf32>, vector<8x1043xf32>, vector<8x1043xf32>, vector<8x1043xf32>, vector<8x1043xf32>, vector<8x1043xf32>, vector<8x1043xf32>, vector<8x1043xf32>, vector<8x1043xf32>, vector<8x1043xf32>, vector<8x1043xf32>, vector<8x1043xf32>, vector<8x1043xf32> -> vector<128x1043xf32>
    %25 = tpu.concatenate %20, %21, %22, %23 in 0 : vector<8x1043xf32>, vector<8x1043xf32>, vector<8x1043xf32>, vector<8x1043xf32> -> vector<32x1043xf32>
    %26 = tpu.concatenate %24, %25 in 0 : vector<128x1043xf32>, vector<32x1043xf32> -> vector<160x1043xf32>
    %cst = arith.constant dense<0.000000e+00> : vector<8x1043xf32>
    %27 = tpu.matmul %2, %26, %cst {dimension_numbers = #tpu.dot_dimension_numbers<[1], [0], [0], [1], [0, 0, 1, 1], [], []>} : vector<8x160xf32>, vector<160x1043xf32>, vector<8x1043xf32> -> vector<8x1043xf32>
    %28 = vector.extract_strided_slice %27 {offsets = [0, 0], sizes = [8, 1024], strides = [1, 1]} : vector<8x1043xf32> to vector<8x1024xf32>
    %29 = vector.extract_strided_slice %27 {offsets = [0, 1], sizes = [8, 1024], strides = [1, 1]} : vector<8x1043xf32> to vector<8x1024xf32>
    %30 = vector.extract_strided_slice %27 {offsets = [0, 2], sizes = [8, 1024], strides = [1, 1]} : vector<8x1043xf32> to vector<8x1024xf32>
    %31 = vector.extract_strided_slice %27 {offsets = [0, 3], sizes = [8, 1024], strides = [1, 1]} : vector<8x1043xf32> to vector<8x1024xf32>
    %32 = vector.extract_strided_slice %27 {offsets = [0, 4], sizes = [8, 1024], strides = [1, 1]} : vector<8x1043xf32> to vector<8x1024xf32>
    %33 = vector.extract_strided_slice %27 {offsets = [0, 5], sizes = [8, 1024], strides = [1, 1]} : vector<8x1043xf32> to vector<8x1024xf32>
    %34 = vector.extract_strided_slice %27 {offsets = [0, 6], sizes = [8, 1024], strides = [1, 1]} : vector<8x1043xf32> to vector<8x1024xf32>
    %35 = vector.extract_strided_slice %27 {offsets = [0, 7], sizes = [8, 1024], strides = [1, 1]} : vector<8x1043xf32> to vector<8x1024xf32>
    %36 = vector.extract_strided_slice %27 {offsets = [0, 8], sizes = [8, 1024], strides = [1, 1]} : vector<8x1043xf32> to vector<8x1024xf32>
    %37 = vector.extract_strided_slice %27 {offsets = [0, 9], sizes = [8, 1024], strides = [1, 1]} : vector<8x1043xf32> to vector<8x1024xf32>
    %38 = vector.extract_strided_slice %27 {offsets = [0, 10], sizes = [8, 1024], strides = [1, 1]} : vector<8x1043xf32> to vector<8x1024xf32>
    %39 = vector.extract_strided_slice %27 {offsets = [0, 11], sizes = [8, 1024], strides = [1, 1]} : vector<8x1043xf32> to vector<8x1024xf32>
    %40 = vector.extract_strided_slice %27 {offsets = [0, 12], sizes = [8, 1024], strides = [1, 1]} : vector<8x1043xf32> to vector<8x1024xf32>
    %41 = vector.extract_strided_slice %27 {offsets = [0, 13], sizes = [8, 1024], strides = [1, 1]} : vector<8x1043xf32> to vector<8x1024xf32>
    %42 = vector.extract_strided_slice %27 {offsets = [0, 14], sizes = [8, 1024], strides = [1, 1]} : vector<8x1043xf32> to vector<8x1024xf32>
    %43 = vector.extract_strided_slice %27 {offsets = [0, 15], sizes = [8, 1024], strides = [1, 1]} : vector<8x1043xf32> to vector<8x1024xf32>
    %44 = vector.extract_strided_slice %27 {offsets = [0, 16], sizes = [8, 1024], strides = [1, 1]} : vector<8x1043xf32> to vector<8x1024xf32>
    %45 = vector.extract_strided_slice %27 {offsets = [0, 17], sizes = [8, 1024], strides = [1, 1]} : vector<8x1043xf32> to vector<8x1024xf32>
    %46 = vector.extract_strided_slice %27 {offsets = [0, 18], sizes = [8, 1024], strides = [1, 1]} : vector<8x1043xf32> to vector<8x1024xf32>
    %47 = vector.extract_strided_slice %27 {offsets = [0, 19], sizes = [8, 1024], strides = [1, 1]} : vector<8x1043xf32> to vector<8x1024xf32>
    %48 = tpu.concatenate %28, %29, %30, %31, %32, %33, %34, %35, %36, %37, %38, %39, %40, %41, %42, %43 in 0 : vector<8x1024xf32>, vector<8x1024xf32>, vector<8x1024xf32>, vector<8x1024xf32>, vector<8x1024xf32>, vector<8x1024xf32>, vector<8x1024xf32>, vector<8x1024xf32>, vector<8x1024xf32>, vector<8x1024xf32>, vector<8x1024xf32>, vector<8x1024xf32>, vector<8x1024xf32>, vector<8x1024xf32>, vector<8x1024xf32>, vector<8x1024xf32> -> vector<128x1024xf32>
    %49 = tpu.concatenate %44, %45, %46, %47 in 0 : vector<8x1024xf32>, vector<8x1024xf32>, vector<8x1024xf32>, vector<8x1024xf32> -> vector<32x1024xf32>
    %50 = tpu.concatenate %48, %49 in 0 : vector<128x1024xf32>, vector<32x1024xf32> -> vector<160x1024xf32>
    %cst_6 = arith.constant dense<0.000000e+00> : vector<8x1024xf32>
    %51 = tpu.matmul %3, %50, %cst_6 {dimension_numbers = #tpu.dot_dimension_numbers<[1], [0], [0], [1], [0, 0, 1, 1], [], []>} : vector<8x160xf32>, vector<160x1024xf32>, vector<8x1024xf32> -> vector<8x1024xf32>
    %52 = vector.extract_strided_slice %51 {offsets = [0, 0], sizes = [8, 64], strides = [1, 1]} : vector<8x1024xf32> to vector<8x64xf32>
    %53 = vector.extract_strided_slice %51 {offsets = [0, 64], sizes = [8, 64], strides = [1, 1]} : vector<8x1024xf32> to vector<8x64xf32>
    %54 = vector.extract_strided_slice %51 {offsets = [0, 128], sizes = [8, 64], strides = [1, 1]} : vector<8x1024xf32> to vector<8x64xf32>
    %55 = vector.extract_strided_slice %51 {offsets = [0, 192], sizes = [8, 64], strides = [1, 1]} : vector<8x1024xf32> to vector<8x64xf32>
    %56 = vector.extract_strided_slice %51 {offsets = [0, 256], sizes = [8, 64], strides = [1, 1]} : vector<8x1024xf32> to vector<8x64xf32>
    %57 = vector.extract_strided_slice %51 {offsets = [0, 320], sizes = [8, 64], strides = [1, 1]} : vector<8x1024xf32> to vector<8x64xf32>
    %58 = vector.extract_strided_slice %51 {offsets = [0, 384], sizes = [8, 64], strides = [1, 1]} : vector<8x1024xf32> to vector<8x64xf32>
    %59 = vector.extract_strided_slice %51 {offsets = [0, 448], sizes = [8, 64], strides = [1, 1]} : vector<8x1024xf32> to vector<8x64xf32>
    %60 = vector.extract_strided_slice %51 {offsets = [0, 512], sizes = [8, 64], strides = [1, 1]} : vector<8x1024xf32> to vector<8x64xf32>
    %61 = vector.extract_strided_slice %51 {offsets = [0, 576], sizes = [8, 64], strides = [1, 1]} : vector<8x1024xf32> to vector<8x64xf32>
    %62 = vector.extract_strided_slice %51 {offsets = [0, 640], sizes = [8, 64], strides = [1, 1]} : vector<8x1024xf32> to vector<8x64xf32>
    %63 = vector.extract_strided_slice %51 {offsets = [0, 704], sizes = [8, 64], strides = [1, 1]} : vector<8x1024xf32> to vector<8x64xf32>
    %64 = vector.extract_strided_slice %51 {offsets = [0, 768], sizes = [8, 64], strides = [1, 1]} : vector<8x1024xf32> to vector<8x64xf32>
    %65 = vector.extract_strided_slice %51 {offsets = [0, 832], sizes = [8, 64], strides = [1, 1]} : vector<8x1024xf32> to vector<8x64xf32>
    %66 = vector.extract_strided_slice %51 {offsets = [0, 896], sizes = [8, 64], strides = [1, 1]} : vector<8x1024xf32> to vector<8x64xf32>
    %67 = vector.extract_strided_slice %51 {offsets = [0, 960], sizes = [8, 64], strides = [1, 1]} : vector<8x1024xf32> to vector<8x64xf32>
    %68 = tpu.concatenate %52, %53, %54, %55, %56, %57, %58, %59, %60, %61, %62, %63, %64, %65, %66, %67 in 0 : vector<8x64xf32>, vector<8x64xf32>, vector<8x64xf32>, vector<8x64xf32>, vector<8x64xf32>, vector<8x64xf32>, vector<8x64xf32>, vector<8x64xf32>, vector<8x64xf32>, vector<8x64xf32>, vector<8x64xf32>, vector<8x64xf32>, vector<8x64xf32>, vector<8x64xf32>, vector<8x64xf32>, vector<8x64xf32> -> vector<128x64xf32>
    %c0_7 = arith.constant 0 : index
    %c0_8 = arith.constant 0 : index
    %69 = vector.load %arg4[%c0_7, %c0_8] : memref<64x5xf32, #tpu.memory_space<vmem>>, vector<64x5xf32>
    %cst_9 = arith.constant dense<0.000000e+00> : vector<128x5xf32>
    %70 = tpu.matmul %68, %69, %cst_9 {dimension_numbers = #tpu.dot_dimension_numbers<[1], [0], [0], [1], [0, 0, 1, 1], [], []>} : vector<128x64xf32>, vector<64x5xf32>, vector<128x5xf32> -> vector<128x5xf32>
    %c0_10 = arith.constant 0 : index
    %c0_11 = arith.constant 0 : index
    %c0_12 = arith.constant 0 : index
    %71 = vector.load %arg5[%c0_10, %c0_11, %c0_12] : memref<1x128x5xf32, #tpu.memory_space<vmem>>, vector<1x128x5xf32>
    %72 = vector.shape_cast %71 : vector<1x128x5xf32> to vector<128x5xf32>
    %73 = vector.shape_cast %70 : vector<128x5xf32> to vector<1x128x5xf32>
    tpu.vector_store %arg5[%c0_10, %c0_11, %c0_12], %73 {strides = array<i32>} : memref<1x128x5xf32, #tpu.memory_space<vmem>>, vector<1x128x5xf32>,
    return
  }
  func.func @transform_0(%arg0: i32) -> (i32, i32, i32) {
    %c0_i32 = arith.constant 0 : i32
    %c0_i32_0 = arith.constant 0 : i32
    %c0_i32_1 = arith.constant 0 : i32
    return %arg0, %c0_i32, %c0_i32_0 : i32, i32, i32
  }
  func.func @transform_1(%arg0: i32) -> (i32, i32) {
    %c0_i32 = arith.constant 0 : i32
    %c0_i32_0 = arith.constant 0 : i32
    %c0_i32_1 = arith.constant 0 : i32
    return %c0_i32, %c0_i32_0 : i32, i32
  }
  func.func @transform_2(%arg0: i32) -> (i32, i32) {
    %c0_i32 = arith.constant 0 : i32
    %c0_i32_0 = arith.constant 0 : i32
    %c0_i32_1 = arith.constant 0 : i32
    return %c0_i32, %c0_i32_0 : i32, i32
  }
  func.func @transform_3(%arg0: i32) -> (i32, i32) {
    %c0_i32 = arith.constant 0 : i32
    %c0_i32_0 = arith.constant 0 : i32
    %c0_i32_1 = arith.constant 0 : i32
    return %c0_i32, %c0_i32_0 : i32, i32
  }
  func.func @transform_4(%arg0: i32) -> (i32, i32, i32) {
    %c0_i32 = arith.constant 0 : i32
    %c0_i32_0 = arith.constant 0 : i32
    %c0_i32_1 = arith.constant 0 : i32
    return %arg0, %c0_i32, %c0_i32_0 : i32, i32, i32
  }
}

</mosaic_0001>

<bundles_post_ra>
// kernel: tpu_custom_call.1
= control target key start
LH: loop header
LB: loop body
LE: loop exit
PB: predicated region body
PF: predicated region fallthrough
CT: control target
= control target key end

     0   :  { %9 = vsyncpa [#allocation3], 0  ;;  %s5632_s0 = inlined_call_operand.vmem [shape: f32[1,8,1152], index: 0, kind: input, shape index: {}]   ;;  %s5633_s1 = inlined_call_operand.hbm [shape: f32[8,160], index: 1, kind: input, shape index: {}]   ;;  %s5634_s2 = inlined_call_operand.hbm [shape: f32[8,160], index: 2, kind: input, shape index: {}]   ;;  %s5635_s3 = inlined_call_operand.vmem [shape: f32[64,5], index: 3, kind: input, shape index: {}]   ;;  %s5636_s4 = inlined_call_operand.vmem [shape: f32[1,128,5], index: 4, kind: output, shape index: {}]  }
   0x1   :  { %s18_s17 = sshll.u32 %s5633_s1, 4  ;;  %s19_s17 = int_to_ptr.hbm [resolvable:$true] %s18_s17 }
   0x2   :  { %10 = vsyncpa [#allocation5], 0  ;;  %s3161_s18 = smov [#allocation2]   ;;  %s29_s22 = sshll.u32 %s5634_s2, 4  ;;  %s30_s22 = int_to_ptr.hbm [resolvable:$true] %s29_s22 }
   0x3   :  { %s20_s19 = sshll.u32 %s3161_s18, 4  ;;  %s3162_s23 = smov [#allocation4]   ;;  %s21_s19 = int_to_ptr.vmem [resolvable:$true] %s20_s19 }
   0x4   :  { %23 = dma.hbm_to_vmem [thread:$0]  %s19_s17, 256, %s21_s19, [#allocation3]  }
   0x5   :  { %s31_s24 = sshll.u32 %s3162_s23, 4  ;;  %s32_s24 = int_to_ptr.vmem [resolvable:$true] %s31_s24 }
   0x6   :  { %34 = dma.hbm_to_vmem [thread:$0]  %s30_s22, 256, %s32_s24, [#allocation5]  }
   0x7   :  { %3157 = dma.done.wait [#allocation3], 256  }
   0x8   :  { %3158 = vsyncadd [#allocation3], 4294967040 }
   0x9   :  { %3159 = dma.done.wait [#allocation5], 256  }
   0xa   :  { %3160 = vsyncadd [#allocation5], 4294967040  ;;  %v3214_v0 = vld [vmem:[%s5632_s0 + $0x40] sm:$0xff]  ;;  %v3224_v2 = vld [vmem:[%s5632_s0 + $0x28] sm:$0xff]  ;;  %s3163_s29 = smov 127   ;;  %s3164_s16 = smov 126  }
   0xb   :  { %v3219_v1 = vld [vmem:[%s5632_s0 + $0x20] sm:$0xff]  ;;  %83 = vrot.lane.b32.xlu2 %v3214_v0, %s3163_s29  ;;  %v46_v5 = vld [vmem:[%s5632_s0 + $0x8] sm:$0xff]  ;;  %v3250_v7 = vld [vmem:[%s5632_s0 + $0x30] sm:$0xff]  ;;  %s3165_s17 = smov 125   ;;  %s3166_s18 = smov 124   ;;  %vm85_vm0 = vcmask 1039360  }
   0xc   :  { %v3230_v3 = vpack.i.bf16 %v3224_v2, %v3219_v1  ;;  %v3235_v4 = vld [vmem:[%s5632_s0] sm:$0xff]  ;;  %v52_v8 = vld [vmem:[%s5632_s0 + $0x38] sm:$0xff]  ;;  %v3258_v9 = vld [vmem:[%s5632_s0 + $0x10] sm:$0xff]  ;;  %s3167_s19 = smov 123   ;;  %s3168_s20 = smov 122   ;;  %vm5697_vm1 = vcmask 1031168  }
   0xd   :  { %v3241_v6 = vpack.i.bf16 %v46_v5, %v3235_v4  ;;  %v3263_v10 = vld [vmem:[%s5632_s0 + $0x18] sm:$0xff]  ;;  %v3266_v11 = vpack.i.bf16 %v52_v8, %v3250_v7  ;;  %s3169_s21 = smov 121   ;;  %s3170_s22 = smov 120   ;;  %v2596_v43 = vpack.i.bf16 %v3224_v2, %v3258_v9  ;;  %vm157_vm2 = vcmask 1022976  }
   0xe   :  { %2322 = vrot.lane.b32.xlu1 %v3230_v3, %s3163_s29  ;;  %v3270_v12 = vpack.i.bf16 %v3263_v10, %v3258_v9  ;;  %s3171_s23 = smov 119   ;;  %s3172_s24 = smov 118   ;;  %v3469_v45 = vpack.i.bf16 %v3219_v1, %v3263_v10  ;;  %vm5701_vm3 = vcmask 965632   ;;  %vm445_vm4 = vcmask 957440  }
   0xf   :  { %2312 = vrot.lane.b32.xlu0 %v3241_v6, %s3163_s29  ;;  %s3173_s1 = smov 117   ;;  %s3174_s25 = smov 116   ;;  %vm481_vm5 = vcmask 949248   ;;  %vm589_vm6 = vcmask 924672   ;;  %vm553_vm7 = vcmask 932864   ;;  %vm517_vm8 = vcmask 941056  }
  0x10   :  { %s3175_s26 = smov 115   ;;  %s3176_s27 = smov 114   ;;  %vm373_vm9 = vcmask 973824   ;;  %vm337_vm10 = vcmask 982016   ;;  %vm265_vm11 = vcmask 998400   ;;  %vm301_vm12 = vcmask 990208  }
  0x11   :  { %s3177_s2 = smov 113   ;;  %s3178_s28 = smov 112   ;;  %vm679_vm13 = vcmask 916480   ;;  %vm5767_vm14 = vcmask 1006592   ;;  %vm5737_vm15 = vcmask 1014784  }
  0x13   :  { %2332 = vrot.lane.b32.xlu2 %v3241_v6, %s3164_s16 }
  0x16   :  { %2327 = vrot.lane.b32.xlu1 %v3266_v11, %s3163_s29 }
  0x17   :  { %2317 = vrot.lane.b32.xlu0 %v3270_v12, %s3163_s29 }
  0x1b   :  { %2347 = vrot.lane.b32.xlu2 %v3266_v11, %s3164_s16 }
  0x1e   :  { %2342 = vrot.lane.b32.xlu1 %v3230_v3, %s3164_s16 }
  0x1f   :  { %2337 = vrot.lane.b32.xlu0 %v3270_v12, %s3164_s16 }
  0x23   :  { %2357 = vrot.lane.b32.xlu2 %v3270_v12, %s3165_s17 }
  0x26   :  { %2352 = vrot.lane.b32.xlu1 %v3241_v6, %s3165_s17 }
  0x27   :  { %119 = vrot.lane.b32.xlu0 %v3214_v0, %s3164_s16 }
  0x2b   :  { %155 = vrot.lane.b32.xlu2 %v3214_v0, %s3165_s17 }
  0x2e   :  { %2367 = vrot.lane.b32.xlu1 %v3266_v11, %s3165_s17 }
  0x2f   :  { %2362 = vrot.lane.b32.xlu0 %v3230_v3, %s3165_s17 }
  0x33   :  { %2382 = vrot.lane.b32.xlu2 %v3230_v3, %s3166_s18 }
  0x36   :  { %2377 = vrot.lane.b32.xlu1 %v3270_v12, %s3166_s18 }
  0x37   :  { %2372 = vrot.lane.b32.xlu0 %v3241_v6, %s3166_s18 }
  0x3b   :  { %2392 = vrot.lane.b32.xlu2 %v3241_v6, %s3167_s19 }
  0x3e   :  { %191 = vrot.lane.b32.xlu1 %v3214_v0, %s3166_s18 }
  0x3f   :  { %2387 = vrot.lane.b32.xlu0 %v3266_v11, %s3166_s18 }
  0x43   :  { %2407 = vrot.lane.b32.xlu2 %v3266_v11, %s3167_s19 }
  0x46   :  { %2402 = vrot.lane.b32.xlu1 %v3230_v3, %s3167_s19 }
  0x47   :  { %2397 = vrot.lane.b32.xlu0 %v3270_v12, %s3167_s19 }
  0x4b   :  { %2417 = vrot.lane.b32.xlu2 %v3270_v12, %s3168_s20 }
  0x4e   :  { %2412 = vrot.lane.b32.xlu1 %v3241_v6, %s3168_s20 }
  0x4f   :  { %227 = vrot.lane.b32.xlu0 %v3214_v0, %s3167_s19 }
  0x53   :  { %263 = vrot.lane.b32.xlu2 %v3214_v0, %s3168_s20 }
  0x56   :  { %2427 = vrot.lane.b32.xlu1 %v3266_v11, %s3168_s20 }
  0x57   :  { %2422 = vrot.lane.b32.xlu0 %v3230_v3, %s3168_s20 }
  0x5b   :  { %2442 = vrot.lane.b32.xlu2 %v3230_v3, %s3169_s21 }
  0x5e   :  { %2437 = vrot.lane.b32.xlu1 %v3270_v12, %s3169_s21 }
  0x5f   :  { %2432 = vrot.lane.b32.xlu0 %v3241_v6, %s3169_s21 }
  0x63   :  { %2452 = vrot.lane.b32.xlu2 %v3241_v6, %s3170_s22 }
  0x65   :  { %v3334_v13 = vpop.permute.xlu2 %83 }
  0x66   :  { %5786 = vst [vmem:[#allocation8_spill] sm:$0xff] %v3334_v13  ;;  %299 = vrot.lane.b32.xlu1 %v3214_v0, %s3169_s21 }
  0x67   :  { %2447 = vrot.lane.b32.xlu0 %v3266_v11, %s3169_s21 }
  0x6b   :  { %2467 = vrot.lane.b32.xlu2 %v3266_v11, %s3170_s22 }
  0x6d   :  { %v3344_v14 = vpop.permute.xlu2 %2332 }
  0x6e   :  { %2462 = vrot.lane.b32.xlu1 %v3230_v3, %s3170_s22  ;;  %v2335_v46 = vunpack.i.h.bf16 %v3344_v14  ;;  %v2334_v47 = vunpack.i.l.bf16 %v3344_v14 }
  0x6f   :  { %2457 = vrot.lane.b32.xlu0 %v3270_v12, %s3170_s22 }
  0x70   :  { %v3497_v59 = vsel %vm5697_vm1, %v2334_v47, %v2335_v46 }
  0x73   :  { %2477 = vrot.lane.b32.xlu2 %v3270_v12, %s3171_s23 }
  0x75   :  { %v3352_v15 = vpop.permute.xlu2 %2347 }
  0x76   :  { %2472 = vrot.lane.b32.xlu1 %v3241_v6, %s3171_s23 }
  0x77   :  { %335 = vrot.lane.b32.xlu0 %v3214_v0, %s3170_s22 }
  0x7b   :  { %371 = vrot.lane.b32.xlu2 %v3214_v0, %s3171_s23 }
  0x7d   :  { %v3360_v16 = vpop.permute.xlu2 %2357 }
  0x7e   :  { %2487 = vrot.lane.b32.xlu1 %v3266_v11, %s3171_s23  ;;  %v2359_v55 = vunpack.i.l.bf16 %v3360_v16  ;;  %v2360_v1 = vunpack.i.h.bf16 %v3360_v16 }
  0x7f   :  { %2482 = vrot.lane.b32.xlu0 %v3230_v3, %s3171_s23 }
  0x80   :  { %v3364_v17 = vpop.permute.xlu1 %2322  ;;  %v3525_v14 = vsel %vm157_vm2, %v2359_v55, %v2360_v1 }
  0x81   :  { %v3366_v18 = vpop.permute.xlu0 %2312  ;;  %5799 = vst [vmem:[#allocation21_spill] sm:$0xff] %v3525_v14 }
  0x82   :  { %v2315_v48 = vunpack.i.h.bf16 %v3366_v18  ;;  %v2314_v49 = vunpack.i.l.bf16 %v3366_v18 }
  0x83   :  { %2502 = vrot.lane.b32.xlu2 %v3230_v3, %s3172_s24 }
  0x84   :  { %v3494_v58 = vsel %vm85_vm0, %v2314_v49, %v2315_v48 }
  0x85   :  { %v3372_v19 = vpop.permute.xlu2 %155 }
  0x86   :  { %2497 = vrot.lane.b32.xlu1 %v3270_v12, %s3172_s24  ;;  %5787 = vst [vmem:[#allocation9_spill] sm:$0xff] %v3372_v19 }
  0x87   :  { %2492 = vrot.lane.b32.xlu0 %v3241_v6, %s3172_s24 }
  0x88   :  { %v3376_v20 = vpop.permute.xlu1 %2327 }
  0x89   :  { %5788 = vst [vmem:[#allocation10_spill] sm:$0xff] %v3376_v20  ;;  %v3378_v21 = vpop.permute.xlu0 %2317 }
  0x8a   :  { %v2319_v44 = vunpack.i.l.bf16 %v3378_v21 }
  0x8b   :  { %2512 = vrot.lane.b32.xlu2 %v3241_v6, %s3173_s1 }
  0x8c   :  { %v3486_v54 = vsel %vm85_vm0, %v2315_v48, %v2319_v44 }
  0x8d   :  { %v3384_v22 = vpop.permute.xlu2 %2382  ;;  %v2616_v61 = vpack.i.bf16 %v3486_v54, %v3494_v58 }
  0x8e   :  { %407 = vrot.lane.b32.xlu1 %v3214_v0, %s3172_s24  ;;  %5789 = vst [vmem:[#allocation11_spill] sm:$0xff] %v3384_v22 }
  0x8f   :  { %2507 = vrot.lane.b32.xlu0 %v3266_v11, %s3172_s24 }
  0x90   :  { %v3388_v23 = vpop.permute.xlu1 %2342 }
  0x91   :  { %v3390_v24 = vpop.permute.xlu0 %2337 }
  0x92   :  { %v2339_v50 = vunpack.i.l.bf16 %v3390_v24  ;;  %v2340_v5 = vunpack.i.h.bf16 %v3390_v24 }
  0x93   :  { %2527 = vrot.lane.b32.xlu2 %v3266_v11, %s3173_s1 }
  0x94   :  { %v3500_v60 = vsel %vm5697_vm1, %v2335_v46, %v2339_v50 }
  0x95   :  { %v3396_v25 = vpop.permute.xlu2 %2392 }
  0x96   :  { %2522 = vrot.lane.b32.xlu1 %v3230_v3, %s3173_s1 }
  0x97   :  { %2517 = vrot.lane.b32.xlu0 %v3270_v12, %s3173_s1 }
  0x98   :  { %v3400_v26 = vpop.permute.xlu1 %2352 }
  0x99   :  { %v3402_v27 = vpop.permute.xlu0 %119  ;;  %v2355_v51 = vunpack.i.h.bf16 %v3400_v26  ;;  %v2354_v52 = vunpack.i.l.bf16 %v3400_v26  ;;  %v2345_v26 = vunpack.i.h.bf16 %v3388_v23 }
  0x9a   :  { %5790 = vst [vmem:[#allocation12_spill] sm:$0xff] %v3402_v27 }
  0x9b   :  { %2537 = vrot.lane.b32.xlu2 %v3270_v12, %s3174_s25  ;;  %v3505_v62 = vsel %vm157_vm2, %v2354_v52, %v2355_v51  ;;  %v3508_v63 = vsel %vm157_vm2, %v2355_v51, %v2359_v55 }
  0x9c   :  { %v2606_v8 = vpack.i.bf16 %v3508_v63, %v3505_v62 }
  0x9d   :  { %v3408_v28 = vpop.permute.xlu2 %2407 }
  0x9e   :  { %2532 = vrot.lane.b32.xlu1 %v3241_v6, %s3174_s25  ;;  %5791 = vst [vmem:[#allocation13_spill] sm:$0xff] %v3408_v28 }
  0x9f   :  { %443 = vrot.lane.b32.xlu0 %v3214_v0, %s3173_s1 }
  0xa0   :  { %v3412_v29 = vpop.permute.xlu1 %2367 }
  0xa1   :  { %v3414_v30 = vpop.permute.xlu0 %2362 }
  0xa2   :  { %v2364_v46 = vunpack.i.l.bf16 %v3414_v30  ;;  %v2365_v48 = vunpack.i.h.bf16 %v3414_v30 }
  0xa3   :  { %479 = vrot.lane.b32.xlu2 %v3214_v0, %s3174_s25 }
  0xa4   :  { %v3556_v55 = vsel %vm157_vm2, %v2360_v1, %v2364_v46 }
  0xa5   :  { %v3420_v31 = vpop.permute.xlu2 %2417  ;;  %5805 = vst [vmem:[#allocation27_spill] sm:$0xff] %v3556_v55 }
  0xa6   :  { %2547 = vrot.lane.b32.xlu1 %v3266_v11, %s3174_s25 }
  0xa7   :  { %2542 = vrot.lane.b32.xlu0 %v3230_v3, %s3174_s25 }
  0xa8   :  { %v3424_v32 = vpop.permute.xlu1 %2377 }
  0xa9   :  { %v3426_v33 = vpop.permute.xlu0 %2372 }
  0xab   :  { %2562 = vrot.lane.b32.xlu2 %v3230_v3, %s3175_s26 }
  0xad   :  { %v3432_v34 = vpop.permute.xlu2 %263 }
  0xae   :  { %2557 = vrot.lane.b32.xlu1 %v3270_v12, %s3175_s26  ;;  %5792 = vst [vmem:[#allocation14_spill] sm:$0xff] %v3432_v34 }
  0xaf   :  { %2552 = vrot.lane.b32.xlu0 %v3241_v6, %s3175_s26 }
  0xb0   :  { %v3436_v35 = vpop.permute.xlu1 %191 }
  0xb1   :  { %5793 = vst [vmem:[#allocation15_spill] sm:$0xff] %v3436_v35  ;;  %v3438_v36 = vpop.permute.xlu0 %2387  ;;  %v2370_v35 = vunpack.i.h.bf16 %v3412_v29 }
  0xb2   :  { %5794 = vst [vmem:[#allocation16_spill] sm:$0xff] %v3438_v36 }
  0xb3   :  { %2572 = vrot.lane.b32.xlu2 %v3241_v6, %s3176_s27 }
  0xb5   :  { %v3444_v37 = vpop.permute.xlu2 %2442 }
  0xb6   :  { %515 = vrot.lane.b32.xlu1 %v3214_v0, %s3175_s26 }
  0xb7   :  { %2567 = vrot.lane.b32.xlu0 %v3266_v11, %s3175_s26 }
  0xb8   :  { %v3448_v38 = vpop.permute.xlu1 %2402 }
  0xb9   :  { %v3450_v39 = vpop.permute.xlu0 %2397 }
  0xbb   :  { %2587 = vrot.lane.b32.xlu2 %v3230_v3, %s3176_s27  ;;  %v2611_v3 = vpack.i.bf16 %v3500_v60, %v3497_v59 }
  0xbd   :  { %v3456_v40 = vpop.permute.xlu2 %2452 }
  0xbe   :  { %2582 = vrot.lane.b32.xlu1 %v3241_v6, %s3177_s2 }
  0xbf   :  { %2577 = vrot.lane.b32.xlu0 %v3270_v12, %s3176_s27  ;;  %v3522_v12 = vsel %vm5697_vm1, %v2339_v50, %v2340_v5 }
  0xc0   :  { %v3460_v41 = vpop.permute.xlu1 %2412  ;;  %5798 = vst [vmem:[#allocation20_spill] sm:$0xff] %v3522_v12  ;;  %v2631_v24 = vpack.i.bf16 %v3522_v12, %v3525_v14 }
  0xc1   :  { %v3462_v42 = vpop.permute.xlu0 %227 }
  0xc2   :  { %5795 = vst [vmem:[#allocation17_spill] sm:$0xff] %v3462_v42 }
  0xc3   :  { %2602 = vrot.lane.b32.xlu2 %v3266_v11, %s3176_s27 }
  0xc5   :  { %v3481_v53 = vpop.permute.xlu2 %2467 }
  0xc6   :  { %2597 = vrot.lane.b32.xlu1 %v2596_v43, %s3177_s2  ;;  %5796 = vst [vmem:[#allocation18_spill] sm:$0xff] %v3481_v53  ;;  %v2344_v43 = vunpack.i.l.bf16 %v3388_v23  ;;  %v2320_v23 = vunpack.i.h.bf16 %v3378_v21 }
  0xc7   :  { %2592 = vrot.lane.b32.xlu0 %v3469_v45, %s3177_s2 }
  0xc8   :  { %v3489_v56 = vpop.permute.xlu1 %2427  ;;  %v3545_v49 = vsel %vm5697_vm1, %v2340_v5, %v2344_v43  ;;  %v3548_v50 = vsel %vm5697_vm1, %v2344_v43, %v2345_v26  ;;  %v3564_v30 = vsel %vm85_vm0, %v2319_v44, %v2320_v23 }
  0xc9   :  { %5797 = vst [vmem:[#allocation19_spill] sm:$0xff] %v3489_v56  ;;  %v3491_v57 = vpop.permute.xlu0 %2422  ;;  %v2636_v1 = vpack.i.bf16 %v3258_v9, %v3564_v30 }
  0xca   :  { %5801 = vst [vmem:[#allocation23_spill] sm:$0xff] %v3545_v49 }
  0xcb   :  { %2617 = vrot.lane.b32.xlu2 %v2616_v61, %s3178_s28  ;;  %5802 = vst [vmem:[#allocation24_spill] sm:$0xff] %v3548_v50  ;;  %v2369_v61 = vunpack.i.l.bf16 %v3412_v29 }
  0xcc   :  { %5807 = vst [vmem:[#allocation29_spill] sm:$0xff] %v3564_v30 }
  0xcd   :  { %v3517_v10 = vpop.permute.xlu2 %2477  ;;  %v3578_v44 = vsel %vm157_vm2, %v2365_v48, %v2369_v61  ;;  %v3619_v34 = vsel %vm157_vm2, %v2369_v61, %v2370_v35 }
  0xce   :  { %2612 = vrot.lane.b32.xlu1 %v2611_v3, %s3178_s28  ;;  %v2349_v3 = vunpack.i.l.bf16 %v3352_v15  ;;  %5809 = vst [vmem:[#allocation31_spill] sm:$0xff] %v3578_v44 }
  0xcf   :  { %2607 = vrot.lane.b32.xlu0 %v2606_v8, %s3178_s28  ;;  %v2325_v8 = vunpack.i.h.bf16 %v3364_v17  ;;  %5815 = vst [vmem:[#allocation37_spill] sm:$0xff] %v3619_v34 }
  0xd0   :  { %v3527_v16 = vpop.permute.xlu1 %2437 }
  0xd1   :  { %v3529_v18 = vpop.permute.xlu0 %2432 }
  0xd3   :  { %2632 = vrot.lane.b32.xlu2 %v2631_v24, %s3178_s28  ;;  %v2324_v24 = vunpack.i.l.bf16 %v3364_v17 }
  0xd5   :  { %v3537_v47 = vpop.permute.xlu2 %371  ;;  %v3598_v17 = vsel %vm85_vm0, %v2324_v24, %v2325_v8 }
  0xd6   :  { %5800 = vst [vmem:[#allocation22_spill] sm:$0xff] %v3537_v47  ;;  %2627 = vrot.lane.b32.xlu1 %v3266_v11, %s3177_s2  ;;  %v3559_v11 = vsel %vm157_vm2, %v2364_v46, %v2365_v48  ;;  %v5641_v48 = vunpack.i.h.bf16 %v3376_v20 }
  0xd7   :  { %2622 = vrot.lane.b32.xlu0 %v3241_v6, %s3178_s28  ;;  %5806 = vst [vmem:[#allocation28_spill] sm:$0xff] %v3559_v11  ;;  %v2646_v6 = vpack.i.bf16 %v3548_v50, %v3545_v49  ;;  %v2641_v21 = vpack.i.bf16 %v3559_v11, %v3556_v55 }
  0xd8   :  { %v3551_v51 = vpop.permute.xlu1 %299  ;;  %5812 = vst [vmem:[#allocation34_spill] sm:$0xff] %v3598_v17 }
  0xd9   :  { %5803 = vst [vmem:[#allocation25_spill] sm:$0xff] %v3551_v51  ;;  %v3553_v52 = vpop.permute.xlu0 %2447 }
  0xda   :  { %5804 = vst [vmem:[#allocation26_spill] sm:$0xff] %v3553_v52 }
  0xdb   :  { %2647 = vrot.lane.b32.xlu2 %v2646_v6, %s3178_s28  ;;  %v3587_v6 = vsel %vm5697_vm1, %v2345_v26, %v2349_v3 }
  0xdc   :  { %5810 = vst [vmem:[#allocation32_spill] sm:$0xff] %v3587_v6  ;;  %v2661_v9 = vpack.i.bf16 %v3587_v6, %v3578_v44 }
  0xdd   :  { %v3573_v5 = vpop.permute.xlu2 %2502 }
  0xde   :  { %5808 = vst [vmem:[#allocation30_spill] sm:$0xff] %v3573_v5  ;;  %2642 = vrot.lane.b32.xlu1 %v2641_v21, %s3178_s28  ;;  %v3592_v21 = vsel %vm85_vm0, %v2320_v23, %v2324_v24  ;;  %v2350_v23 = vunpack.i.h.bf16 %v3352_v15 }
  0xdf   :  { %2637 = vrot.lane.b32.xlu0 %v2636_v1, %s3178_s28  ;;  %5811 = vst [vmem:[#allocation33_spill] sm:$0xff] %v3592_v21  ;;  %v2329_v1 = vunpack.i.l.bf16 %v3376_v20  ;;  %v2651_v26 = vpack.i.bf16 %v3598_v17, %v3592_v21 }
  0xe0   :  { %v3582_v43 = vpop.permute.xlu1 %2462  ;;  %v3627_v15 = vsel %vm5697_vm1, %v2349_v3, %v2350_v23 }
  0xe1   :  { %v3584_v46 = vpop.permute.xlu0 %2457  ;;  %5817 = vst [vmem:[#allocation39_spill] sm:$0xff] %v3627_v15 }
  0xe3   :  { %2662 = vrot.lane.b32.xlu2 %v2661_v9, %s3178_s28  ;;  %v3612_v9 = vsel %vm85_vm0, %v2329_v1, %v5641_v48 }
  0xe4   :  { %5813 = vst [vmem:[#allocation35_spill] sm:$0xff] %v3612_v9  ;;  %v2676_v51 = vpack.i.bf16 %v3250_v7, %v3612_v9  ;;  %v3640_v7 = vsel %vm157_vm2, %v2370_v35, %v3372_v19 }
  0xe5   :  { %v3603_v42 = vpop.permute.xlu2 %2512  ;;  %5818 = vst [vmem:[#allocation40_spill] sm:$0xff] %v3640_v7 }
  0xe6   :  { %2657 = vrot.lane.b32.xlu1 %v3469_v45, %s3178_s28  ;;  %v3624_v45 = vsel %vm85_vm0, %v2325_v8, %v2329_v1  ;;  %v5651_v8 = vunpack.i.l.bf16 %v3573_v5  ;;  %v2515_v30 = vunpack.i.h.bf16 %v3603_v42 }
  0xe7   :  { %2652 = vrot.lane.b32.xlu0 %v2651_v26, %s3178_s28  ;;  %5816 = vst [vmem:[#allocation38_spill] sm:$0xff] %v3624_v45  ;;  %v2671_v26 = vpack.i.bf16 %v3627_v15, %v3619_v34  ;;  %v2666_v48 = vpack.i.bf16 %v3224_v2, %v3624_v45 }
  0xe8   :  { %v3614_v24 = vpop.permute.xlu1 %2472 }
  0xe9   :  { %v3616_v29 = vpop.permute.xlu0 %335 }
  0xea   :  { %5814 = vst [vmem:[#allocation36_spill] sm:$0xff] %v3616_v29 }
  0xeb   :  { %2677 = vrot.lane.b32.xlu2 %v2676_v51, %s3178_s28  ;;  %v3648_v51 = vsel %vm5697_vm1, %v2350_v23, %v3402_v27  ;;  %v5660_v27 = vunpack.i.h.bf16 %v3573_v5  ;;  %v2414_v5 = vunpack.i.l.bf16 %v3460_v41  ;;  %vm748_vm1 = vcmask 261120  }
  0xec   :  { %5820 = vst [vmem:[#allocation42_spill] sm:$0xff] %v3648_v51  ;;  %v2691_v2 = vpack.i.bf16 %v3648_v51, %v3640_v7  ;;  %v2706_v51 = vpack.i.bf16 %v3214_v0, %v3334_v13 }
  0xed   :  { %v3634_v29 = vpop.permute.xlu2 %2527 }
  0xee   :  { %2672 = vrot.lane.b32.xlu1 %v2671_v26, %s3178_s28 }
  0xef   :  { %2667 = vrot.lane.b32.xlu0 %v2666_v48, %s3178_s28 }
  0xf0   :  { %v3642_v61 = vpop.permute.xlu1 %2487 }
  0xf1   :  { %5819 = vst [vmem:[#allocation41_spill] sm:$0xff] %v3642_v61  ;;  %v3644_v3 = vpop.permute.xlu0 %2482  ;;  %v2454_v61 = vunpack.i.l.bf16 %v3456_v40 }
  0xf3   :  { %2692 = vrot.lane.b32.xlu2 %v2691_v2, %s3178_s28 }
  0xf5   :  { %v3654_v48 = vpop.permute.xlu2 %2537 }
  0xf8   :  { %v3656_v1 = vpop.permute.xlu1 %2497 }
  0xf9   :  { %v5653_v35 = vunpack.i.h.bf16 %v3656_v1  ;;  %v5652_v26 = vunpack.i.l.bf16 %v3656_v1  ;;  %v3660_v47 = vpop.permute.xlu0 %2492 }
  0xfa   :  { %v5654_v23 = vunpack.i.h.bf16 %v3660_v47 }
  0xfb   :  { %v3670_v2 = vsel %vm5701_vm3, %v5653_v35, %v5651_v8  ;;  %2707 = vrot.lane.b32.xlu2 %v2706_v51, %s3178_s28 }
  0xfc   :  { %v3678_v7 = vsel %vm5701_vm3, %v5654_v23, %v5652_v26  ;;  %v5667_v26 = vunpack.i.l.bf16 %v3634_v29 }
  0xfd   :  { %v3685_v20 = vpop.permute.xlu2 %479 }
  0xfe   :  { %5823 = vst [vmem:[#allocation45_spill] sm:$0xff] %v3685_v20 }
 0x100   :  { %v3681_v19 = vpop.permute.xlu1 %407 }
 0x101   :  { %5821 = vst [vmem:[#allocation43_spill] sm:$0xff] %v3681_v19  ;;  %v3683_v0 = vpop.permute.xlu0 %2507 }
 0x102   :  { %5822 = vst [vmem:[#allocation44_spill] sm:$0xff] %v3683_v0  ;;  %v5659_v8 = vunpack.i.l.bf16 %v3683_v0 }
 0x104   :  { %v3693_v51 = vsel %vm5701_vm3, %v5660_v27, %v5659_v8 }
 0x105   :  { %5824 = vst [vmem:[#allocation46_spill] sm:$0xff] %v3693_v51  ;;  %v3710_v27 = vpop.permute.xlu2 %2562 }
 0x108   :  { %v3696_v35 = vpop.permute.xlu1 %2522 }
 0x109   :  { %v5668_v23 = vunpack.i.h.bf16 %v3696_v35  ;;  %v5669_v19 = vunpack.i.l.bf16 %v3696_v35  ;;  %v3700_v13 = vpop.permute.xlu0 %2517 }
 0x10a   :  { %v5670_v20 = vunpack.i.h.bf16 %v3700_v13 }
 0x10b   :  { %v3708_v8 = vsel %vm445_vm4, %v5668_v23, %v5667_v26 }
 0x10c   :  { %5825 = vst [vmem:[#allocation47_spill] sm:$0xff] %v3708_v8  ;;  %v3717_v45 = vsel %vm445_vm4, %v5670_v20, %v5669_v19 }
 0x10d   :  { %v2573_v9 = vpop.permute.xlu2 %2572 }
 0x10e   :  { %v2575_v11 = vunpack.i.h.bf16 %v2573_v9  ;;  %v2574_v36 = vunpack.i.l.bf16 %v2573_v9 }
 0x110   :  { %v3719_v6 = vpop.permute.xlu1 %2532  ;;  %v554_v52 = vsel %vm553_vm7, %v2574_v36, %v2575_v11  ;;  %v2494_v36 = vunpack.i.l.bf16 %v3660_v47 }
 0x111   :  { %v3721_v44 = vpop.permute.xlu0 %443  ;;  %v2534_v55 = vunpack.i.l.bf16 %v3719_v6 }
 0x112   :  { %5826 = vst [vmem:[#allocation48_spill] sm:$0xff] %v3721_v44 }
 0x115   :  { %v3736_v20 = vpop.permute.xlu2 %2587 }
 0x118   :  { %v3723_v15 = vpop.permute.xlu1 %2547 }
 0x119   :  { %v5679_v34 = vunpack.i.l.bf16 %v3723_v15  ;;  %v3726_v26 = vpop.permute.xlu0 %2542 }
 0x11a   :  { %v5680_v23 = vunpack.i.h.bf16 %v3726_v26 }
 0x11c   :  { %v3734_v19 = vsel %vm481_vm5, %v5680_v23, %v5679_v34 }
 0x11d   :  { %5827 = vst [vmem:[#allocation49_spill] sm:$0xff] %v3734_v19  ;;  %v3744_v8 = vpop.permute.xlu2 %2602 }
 0x120   :  { %v3738_v44 = vpop.permute.xlu1 %2557 }
 0x121   :  { %v2553_v17 = vpop.permute.xlu0 %2552 }
 0x122   :  { %v2554_v23 = vunpack.i.l.bf16 %v2553_v17  ;;  %v2555_v9 = vunpack.i.h.bf16 %v2553_v17 }
 0x124   :  { %v518_v53 = vsel %vm517_vm8, %v2554_v23, %v2555_v9 }
 0x125   :  { %v3750_v56 = vpop.permute.xlu2 %2617 }
 0x128   :  { %v3740_v51 = vpop.permute.xlu1 %515 }
 0x129   :  { %5828 = vst [vmem:[#allocation50_spill] sm:$0xff] %v3740_v51  ;;  %v3742_v50 = vpop.permute.xlu0 %2567  ;;  %v2535_v51 = vunpack.i.h.bf16 %v3719_v6 }
 0x130   :  { %v2583_v28 = vpop.permute.xlu1 %2582 }
 0x131   :  { %v2585_v21 = vunpack.i.h.bf16 %v2583_v28  ;;  %v2584_v49 = vunpack.i.l.bf16 %v2583_v28  ;;  %v3746_v34 = vpop.permute.xlu0 %2577  ;;  %v2514_v28 = vunpack.i.l.bf16 %v3603_v42  ;;  %v2474_v42 = vunpack.i.l.bf16 %v3614_v24 }
 0x132   :  { %v5830_v17 = vunpack.i.l.bf16 %v3746_v34 }
 0x133   :  { %v590_v19 = vsel %vm589_vm6, %v2584_v49, %v2585_v21  ;;  %v446_v23 = vsel %vm445_vm4, %v2514_v28, %v2515_v30 }
 0x134   :  { %752 = vmatpush.msra.mxu0 %v590_v19  ;;  %v5695_v19 = vunpack.i.h.bf16 %v3456_v40  ;;  %v555_v28 = vsel %vm553_vm7, %v2575_v11, %v5830_v17  ;;  %v5832_v11 = vunpack.i.l.bf16 %v3738_v44 }
 0x136   :  { %753 = vmatpush.msra.mxu0 %v554_v52  ;;  %v482_v52 = vsel %vm481_vm5, %v2534_v55, %v2535_v51  ;;  %v519_v17 = vsel %vm517_vm8, %v2555_v9, %v5832_v11  ;;  %v5833_v9 = vunpack.i.l.bf16 %v3654_v48 }
 0x138   :  { %v3757_v12 = vpop.permute.xlu1 %2597  ;;  %754 = vmatpush.msra.mxu0 %v518_v53  ;;  %v483_v11 = vsel %vm481_vm5, %v2535_v51, %v5833_v9 }
 0x139   :  { %v5693_v49 = vunpack.i.l.bf16 %v3757_v12  ;;  %v3762_v0 = vpop.permute.xlu0 %2592 }
 0x13a   :  { %755 = vmatpush.msra.mxu0 %v482_v52  ;;  %v5829_v52 = vunpack.i.h.bf16 %v3660_v47 }
 0x13b   :  { %v591_v53 = vsel %vm589_vm6, %v2585_v21, %v5693_v49  ;;  %v2394_v21 = vunpack.i.l.bf16 %v3396_v25  ;;  %v3783_v49 = vpop.permute.xlu2 %2632 }
 0x13c   :  { %756 = vmatpush.msra.mxu0 %v446_v23  ;;  %792 = vmatpush.msra.mxu2 %v591_v53  ;;  %v410_v6 = vsel %vm5701_vm3, %v2494_v36, %v5829_v52  ;;  %v2434_v23 = vunpack.i.l.bf16 %v3529_v18  ;;  %v5831_v36 = vunpack.i.h.bf16 %v3614_v24  ;;  %v2635_v22 = vunpack.i.h.bf16 %v3783_v49 }
 0x13e   :  { %757 = vmatpush.msra.mxu0 %v410_v6  ;;  %793 = vmatpush.msra.mxu2 %v555_v28  ;;  %v374_v53 = vsel %vm373_vm9, %v2474_v42, %v5831_v36  ;;  %v338_v28 = vsel %vm337_vm10, %v2454_v61, %v5695_v19  ;;  %v2435_v42 = vunpack.i.h.bf16 %v3529_v18  ;;  %v2620_v61 = vunpack.i.h.bf16 %v3750_v56 }
 0x13f   :  { %v5834_v18 = vunpack.i.l.bf16 %v3700_v13  ;;  %v2619_v36 = vunpack.i.l.bf16 %v3750_v56  ;;  %v2544_v56 = vunpack.i.l.bf16 %v3726_v26 }
 0x140   :  { %758 = vmatpush.msra.mxu0 %v374_v53  ;;  %794 = vmatpush.msra.mxu2 %v519_v17  ;;  %v2613_v6 = vpop.permute.xlu1 %2612  ;;  %v302_v19 = vsel %vm301_vm12, %v2434_v23, %v2435_v42  ;;  %v2459_v23 = vunpack.i.l.bf16 %v3584_v46 }
 0x141   :  { %v2608_v55 = vpop.permute.xlu0 %2607  ;;  %v2615_v17 = vunpack.i.h.bf16 %v2613_v6  ;;  %v2614_v14 = vunpack.i.l.bf16 %v2613_v6  ;;  %v447_v47 = vsel %vm445_vm4, %v2515_v30, %v5834_v18  ;;  %v5836_v30 = vunpack.i.h.bf16 %v3460_v41 }
 0x142   :  { %v2610_v52 = vunpack.i.h.bf16 %v2608_v55  ;;  %v2609_v53 = vunpack.i.l.bf16 %v2608_v55  ;;  %759 = vmatpush.msra.mxu0 %v338_v28  ;;  %795 = vmatpush.msra.mxu2 %v483_v11  ;;  %v5835_v55 = vunpack.i.l.bf16 %v3783_v49  ;;  %v2374_v28 = vunpack.i.l.bf16 %v3426_v33 }
 0x143   :  { %v266_v9 = vsel %vm265_vm11, %v2414_v5, %v5836_v30  ;;  %v2439_v11 = vunpack.i.l.bf16 %v3527_v16  ;;  %v5838_v18 = vunpack.i.l.bf16 %v3517_v10  ;;  %v2419_v30 = vunpack.i.l.bf16 %v3420_v31 }
 0x144   :  { %760 = vmatpush.msra.mxu0 %v302_v19  ;;  %v704_v51 = vsel %vm679_vm13, %v2609_v53, %v2610_v52  ;;  %796 = vmatpush.msra.mxu2 %v447_v47  ;;  %v705_v6 = vsel %vm679_vm13, %v2610_v52, %v5835_v55  ;;  %v696_v19 = vsel %vm679_vm13, %v2614_v14, %v2615_v17  ;;  %v2375_v52 = vunpack.i.h.bf16 %v3426_v33 }
 0x145   :  { %784 = vmatpush.msra.mxu1 %v704_v51  ;;  %824 = vmatpush.msra.mxu3 %v705_v6  ;;  %v697_v47 = vsel %vm679_vm13, %v2615_v17, %v2635_v22  ;;  %v5837_v53 = vunpack.i.h.bf16 %v3396_v25  ;;  %v5839_v14 = vunpack.i.h.bf16 %v3614_v24  ;;  %v688_v33 = vsel %vm679_vm13, %v2619_v36, %v2620_v61 }
 0x146   :  { %761 = vmatpush.msra.mxu0 %v266_v9  ;;  %797 = vmatpush.msra.mxu2 %v3678_v7  ;;  %v2594_v51 = vunpack.i.l.bf16 %v3762_v0  ;;  %v5840_v24 = vunpack.i.h.bf16 %v3456_v40 }
 0x147   :  { %785 = vmatpush.msra.mxu1 %v696_v19  ;;  %825 = vmatpush.msra.mxu3 %v697_v47  ;;  %v230_v5 = vsel %vm5767_vm14, %v2394_v21, %v5837_v53  ;;  %v375_v7 = vsel %vm373_vm9, %v5839_v14, %v5838_v18  ;;  %v194_v21 = vsel %vm5737_vm15, %v2374_v28, %v2375_v52  ;;  %v2580_v19 = vunpack.i.h.bf16 %v3746_v34  ;;  %v3859_v53 = vld [vmem:[#allocation2 + $0x8] sm:$0xff] }
 0x148   :  { %762 = vmatpush.msra.mxu0 %v230_v5  ;;  %798 = vmatpush.msra.mxu2 %v375_v7  ;;  %v3835_v17 = vpop.permute.xlu1 %2627  ;;  %v339_v6 = vsel %vm337_vm10, %v5840_v24, %v2459_v23  ;;  %v303_v28 = vsel %vm301_vm12, %v2435_v42, %v2439_v11  ;;  %v2399_v47 = vunpack.i.l.bf16 %v3450_v39  ;;  %v2560_v5 = vunpack.i.h.bf16 %v3738_v44 }
 0x149   :  { %v3841_v55 = vpop.permute.xlu0 %2622  ;;  %786 = vmatpush.msra.mxu1 %v688_v33  ;;  %v5841_v18 = vunpack.i.l.bf16 %v3757_v12  ;;  %v2379_v7 = vunpack.i.l.bf16 %v3424_v32  ;;  %v2540_v33 = vunpack.i.h.bf16 %v3654_v48 }
 0x14a   :  { %v2625_v9 = vunpack.i.h.bf16 %v3841_v55  ;;  %v2624_v36 = vunpack.i.l.bf16 %v3841_v55  ;;  %763 = vmatpush.msra.mxu0 %v194_v21  ;;  %799 = vmatpush.msra.mxu2 %v339_v6  ;;  %v2595_v55 = vunpack.i.h.bf16 %v3762_v0  ;;  %v5843_v21 = vunpack.i.l.bf16 %v3746_v34 }
 0x14b   :  { %v592_v14 = vsel %vm589_vm6, %v5841_v18, %v2594_v51  ;;  %v2589_v34 = vunpack.i.l.bf16 %v3736_v20 }
 0x14c   :  { %764 = vmatpush.msra.mxu0 %v3505_v62  ;;  %v680_v40 = vsel %vm679_vm13, %v2624_v36, %v2625_v9  ;;  %800 = vmatpush.msra.mxu2 %v303_v28  ;;  %v5842_v62 = vunpack.i.h.bf16 %v3460_v41  ;;  %v556_v24 = vsel %vm553_vm7, %v5843_v21, %v2580_v19  ;;  %v3887_v36 = vld [vmem:[#allocation2] sm:$0xff] }
 0x14d   :  { %787 = vmatpush.msra.mxu1 %v680_v40  ;;  %v5845_v40 = vunpack.i.l.bf16 %v3738_v44  ;;  %v5846_v44 = vunpack.i.l.bf16 %v3654_v48  ;;  %v5847_v48 = vunpack.i.h.bf16 %v3700_v13 }
 0x14e   :  { %765 = vmatpush.msra.mxu0 %v3497_v59  ;;  %v267_v42 = vsel %vm265_vm11, %v5842_v62, %v2419_v30  ;;  %2243 = vmatmul.msk.f32.vlgmr.msra.gmra.mxu1 %vm748_vm1, %v3859_v53  ;;  %v5844_v59 = vunpack.i.h.bf16 %v3396_v25 }
 0x14f   :  { %832 = vmatpush.msrb.mxu1 %v592_v14  ;;  %801 = vmatpush.msra.mxu2 %v267_v42  ;;  %v520_v18 = vsel %vm517_vm8, %v5845_v40, %v2560_v5  ;;  %v3895_v14 = vpop.permute.xlu2 %2647  ;;  %v484_v21 = vsel %vm481_vm5, %v5846_v44, %v2540_v33  ;;  %v5848_v40 = vunpack.i.l.bf16 %v3700_v13  ;;  %v5850_v13 = vunpack.i.l.bf16 %v3656_v1 }
 0x150   :  { %v231_v41 = vsel %vm5767_vm14, %v5844_v59, %v2399_v47  ;;  %v3884_v6 = vpop.permute.xlu1 %2642  ;;  %766 = vmatpush.msra.mxu0 %v3494_v58  ;;  %v195_v58 = vsel %vm5737_vm15, %v2375_v52, %v2379_v7  ;;  %v2564_v59 = vunpack.i.l.bf16 %v3710_v27  ;;  %v2480_v52 = vunpack.i.h.bf16 %v3517_v10 }
 0x151   :  { %833 = vmatpush.msrb.mxu1 %v556_v24  ;;  %802 = vmatpush.msra.mxu2 %v231_v41  ;;  %v3890_v28 = vpop.permute.xlu0 %2637  ;;  %v2644_v42 = vunpack.i.l.bf16 %v3884_v6  ;;  %v593_v24 = vsel %vm589_vm6, %v2594_v51, %v2595_v55  ;;  %v2649_v41 = vunpack.i.l.bf16 %v3895_v14  ;;  %v448_v51 = vsel %vm445_vm4, %v5848_v40, %v5847_v48 }
 0x152   :  { %v2640_v25 = vunpack.i.h.bf16 %v3890_v28  ;;  %v2639_v62 = vunpack.i.l.bf16 %v3890_v28  ;;  %767 = vmatpush.msra.mxu0 %v3235_v4  ;;  %v2440_v48 = vunpack.i.h.bf16 %v3527_v16  ;;  %v2460_v40 = vunpack.i.h.bf16 %v3584_v46 }
 0x153   :  { %834 = vmatpush.msrb.mxu1 %v520_v18  ;;  %803 = vmatpush.msra.mxu2 %v195_v58  ;;  %v557_v18 = vsel %vm553_vm7, %v2580_v19, %v2589_v34  ;;  %v5851_v19 = vunpack.i.l.bf16 %v3783_v49  ;;  %v2380_v46 = vunpack.i.h.bf16 %v3424_v32  ;;  %v2604_v28 = vunpack.i.l.bf16 %v3744_v8 }
 0x154   :  { %768 = vmatmul.f32.vlgmr.msra.gmra.mxu0 %v3887_v36  ;;  %v689_v4 = vsel %vm679_vm13, %v2620_v61, %v2639_v62  ;;  %v681_v61 = vsel %vm679_vm13, %v2625_v9, %v2640_v25  ;;  %v521_v9 = vsel %vm517_vm8, %v2560_v5, %v2564_v59  ;;  %v698_v5 = vsel %vm679_vm13, %v2635_v22, %v2649_v41  ;;  %v3101_v22 = vld [vmem:[%s5632_s0 + $0x8] sm:$0xff] }
 0x155   :  { %835 = vmatpush.msrb.mxu1 %v484_v21  ;;  %872 = vmatpush.msrb.mxu0 %v593_v24  ;;  %v706_v44 = vsel %vm679_vm13, %v5851_v19, %v2644_v42  ;;  %v2600_v21 = vunpack.i.h.bf16 %v3757_v12  ;;  %v5852_v24 = vunpack.i.l.bf16 %v3517_v10  ;;  %v2565_v19 = vunpack.i.h.bf16 %v3710_v27 }
 0x156   :  { %804 = vmatpush.msra.mxu2 %v3508_v63  ;;  %826 = vmatpush.msra.mxu3 %v689_v4  ;;  %v5849_v63 = vunpack.i.h.bf16 %v3656_v1  ;;  %v2405_v32 = vunpack.i.h.bf16 %v3448_v38 }
 0x157   :  { %836 = vmatpush.msrb.mxu1 %v448_v51  ;;  %873 = vmatpush.msrb.mxu0 %v557_v18  ;;  %v376_v4 = vsel %vm373_vm9, %v5852_v24, %v2480_v52  ;;  %v2590_v18 = vunpack.i.h.bf16 %v3736_v20  ;;  %v2605_v24 = vunpack.i.h.bf16 %v3744_v8  ;;  %v5874_v20 = vld [vmem:[#allocation13_spill] sm:$0xff] }
 0x158   :  { %805 = vmatpush.msra.mxu2 %v3500_v60  ;;  %827 = vmatpush.msra.mxu3 %v681_v61  ;;  %v412_v58 = vsel %vm5701_vm3, %v5850_v13, %v5849_v63  ;;  %v3944_v60 = vpop.permute.xlu1 %2657  ;;  %v2630_v61 = vunpack.i.h.bf16 %v3835_v17  ;;  %v2420_v63 = vunpack.i.h.bf16 %v3420_v31  ;;  %v2484_v13 = vunpack.i.l.bf16 %v3644_v3 }
 0x159   :  { %837 = vmatpush.msrb.mxu1 %v412_v58  ;;  %874 = vmatpush.msrb.mxu0 %v521_v9  ;;  %v3947_v1 = vpop.permute.xlu0 %2652  ;;  %v2659_v49 = vunpack.i.l.bf16 %v3944_v60  ;;  %v594_v9 = vsel %vm589_vm6, %v2595_v55, %v2600_v21  ;;  %v2424_v31 = vunpack.i.l.bf16 %v3491_v57 }
 0x15a   :  { %864 = vmatpush.msrb.mxu3 %v706_v44  ;;  %806 = vmatpush.msra.mxu2 %v3486_v54  ;;  %v2654_v51 = vunpack.i.l.bf16 %v3947_v1  ;;  %v485_v54 = vsel %vm481_vm5, %v2540_v33, %v2544_v56  ;;  %v340_v33 = vsel %vm337_vm10, %v2459_v23, %v2460_v40  ;;  %v2629_v44 = vunpack.i.l.bf16 %v3835_v17 }
 0x15b   :  { %838 = vmatpush.msrb.mxu1 %v376_v4  ;;  %875 = vmatpush.msrb.mxu0 %v485_v54  ;;  %v2464_v23 = vunpack.i.l.bf16 %v3582_v43  ;;  %v682_v0 = vsel %vm679_vm13, %v2640_v25, %v2659_v49  ;;  %v268_v55 = vsel %vm265_vm11, %v2419_v30, %v2420_v63  ;;  %v522_v25 = vsel %vm517_vm8, %v2564_v59, %v2565_v19 }
 0x15c   :  { %865 = vmatpush.msrb.mxu3 %v698_v5  ;;  %807 = vmatpush.msra.mxu2 %v3101_v22  ;;  %v690_v58 = vsel %vm679_vm13, %v2639_v62, %v2654_v51  ;;  %v304_v62 = vsel %vm301_vm12, %v2439_v11, %v2440_v48  ;;  %v596_v16 = vsel %vm589_vm6, %v2629_v44, %v2630_v61  ;;  %v2400_v11 = vunpack.i.h.bf16 %v3450_v39 }
 0x15d   :  { %808 = vmatmul.f32.vlgmr.msra.gmra.mxu2 %v3887_v36  ;;  %2244 = vmatmul.msk.f32.vlgmr.msra.gmra.mxu3 %vm748_vm1, %v3859_v53  ;;  %v2550_v30 = vunpack.i.h.bf16 %v3723_v15  ;;  %v2570_v4 = vunpack.i.h.bf16 %v3742_v50  ;;  %v2569_v5 = vunpack.i.l.bf16 %v3742_v50  ;;  %v5853_v59 = vunpack.i.h.bf16 %v3726_v26 }
 0x15e   :  { %839 = vmatpush.msrb.mxu1 %v340_v33  ;;  %876 = vmatpush.msrb.mxu0 %v3717_v45  ;;  %v558_v45 = vsel %vm553_vm7, %v2589_v34, %v2590_v18  ;;  %v377_v34 = vsel %vm373_vm9, %v2480_v52, %v2484_v13  ;;  %v232_v10 = vsel %vm5767_vm14, %v2399_v47, %v2400_v11  ;;  %v2404_v47 = vunpack.i.l.bf16 %v3448_v38 }
 0x15f   :  { %912 = vmatpush.msrb.mxu2 %v594_v9  ;;  %866 = vmatpush.msrb.mxu3 %v690_v58  ;;  %v341_v52 = vsel %vm337_vm10, %v2460_v40, %v2464_v23  ;;  %v486_v54 = vsel %vm481_vm5, %v2544_v56, %v5853_v59  ;;  %v560_v39 = vsel %vm553_vm7, %v2604_v28, %v2605_v24  ;;  %v2530_v56 = vunpack.i.h.bf16 %v3634_v29  ;;  %v5856_v9 = vld [vmem:[#allocation11_spill] sm:$0xff]  ;;  %v5862_v59 = vld [vmem:[#allocation41_spill] sm:$0xff] }
 0x160   :  { %840 = vmatpush.msrb.mxu1 %v304_v62  ;;  %877 = vmatpush.msrb.mxu0 %v3670_v2  ;;  %v2444_v2 = vunpack.i.l.bf16 %v3444_v37  ;;  %v196_v40 = vsel %vm5737_vm15, %v2379_v7, %v2380_v46  ;;  %v5854_v22 = vunpack.i.h.bf16 %v3696_v35  ;;  %v5855_v33 = vunpack.i.l.bf16 %v3696_v35 }
 0x161   :  { %913 = vmatpush.msrb.mxu2 %v558_v45  ;;  %867 = vmatpush.msrb.mxu3 %v682_v0  ;;  %v524_v7 = vsel %vm517_vm8, %v2569_v5, %v2570_v4  ;;  %v2384_v62 = vunpack.i.l.bf16 %v5856_v9  ;;  %v2465_v45 = vunpack.i.h.bf16 %v3582_v43  ;;  %v2485_v35 = vunpack.i.h.bf16 %v3644_v3  ;;  %v5857_v0 = vld [vmem:[#allocation21_spill] sm:$0xff]  ;;  %v5883_v3 = vld [vmem:[#allocation39_spill] sm:$0xff] }
 0x162   :  { %841 = vmatpush.msrb.mxu1 %v268_v55  ;;  %878 = vmatpush.msrb.mxu0 %v377_v34  ;;  %v305_v26 = vsel %vm301_vm12, %v2440_v48, %v2444_v2  ;;  %v450_v58 = vsel %vm445_vm4, %v5855_v33, %v5854_v22  ;;  %v269_v48 = vsel %vm265_vm11, %v2420_v63, %v2424_v31  ;;  %v2445_v63 = vunpack.i.h.bf16 %v3444_v37  ;;  %v5864_v33 = vld [vmem:[#allocation20_spill] sm:$0xff] }
 0x163   :  { %914 = vmatpush.msrb.mxu2 %v522_v25  ;;  %992 = vmatpush.msra.mxu3 %v596_v16  ;;  %v5858_v16 = vld [vmem:[#allocation30_spill] sm:$0xff] }
 0x164   :  { %842 = vmatpush.msrb.mxu1 %v232_v10  ;;  %879 = vmatpush.msrb.mxu0 %v341_v52  ;;  %v5859_v55 = vunpack.i.h.bf16 %v5858_v16  ;;  %v5860_v34 = vunpack.i.l.bf16 %v5858_v16  ;;  %v5861_v10 = vunpack.i.l.bf16 %v3723_v15 }
 0x165   :  { %915 = vmatpush.msrb.mxu2 %v486_v54  ;;  %993 = vmatpush.msra.mxu3 %v560_v39  ;;  %v2490_v54 = vunpack.i.h.bf16 %v5862_v59  ;;  %v233_v39 = vsel %vm5767_vm14, %v2400_v11, %v2404_v47  ;;  %v197_v11 = vsel %vm5737_vm15, %v2380_v46, %v2384_v62 }
 0x166   :  { %843 = vmatpush.msrb.mxu1 %v196_v40  ;;  %880 = vmatpush.msrb.mxu0 %v305_v26  ;;  %v414_v25 = vsel %vm5701_vm3, %v5860_v34, %v5859_v55  ;;  %v488_v52 = vsel %vm481_vm5, %v5861_v10, %v2550_v30  ;;  %v2489_v40 = vunpack.i.l.bf16 %v5862_v59  ;;  %v5863_v26 = vld [vmem:[#allocation44_spill] sm:$0xff]  ;;  %v5867_v55 = vld [vmem:[#allocation29_spill] sm:$0xff]  ;;  %v2425_v10 = vunpack.i.h.bf16 %v3491_v57 }
 0x167   :  { %916 = vmatpush.msrb.mxu2 %v450_v58  ;;  %994 = vmatpush.msra.mxu3 %v524_v7  ;;  %v2510_v22 = vunpack.i.h.bf16 %v5863_v26  ;;  %v378_v58 = vsel %vm373_vm9, %v2484_v13, %v2485_v35  ;;  %v5865_v7 = vunpack.i.l.bf16 %v3634_v29  ;;  %v342_v13 = vsel %vm337_vm10, %v2464_v23, %v2465_v45  ;;  %v5869_v23 = vld [vmem:[#allocation27_spill] sm:$0xff] }
 0x168   :  { %844 = vmatpush.msrb.mxu1 %v5857_v0  ;;  %881 = vmatpush.msrb.mxu0 %v269_v48  ;;  %v5866_v0 = vld [vmem:[#allocation18_spill] sm:$0xff]  ;;  %v5868_v34 = vunpack.i.l.bf16 %v5863_v26 }
 0x169   :  { %917 = vmatpush.msrb.mxu2 %v414_v25  ;;  %995 = vmatpush.msra.mxu3 %v488_v52  ;;  %v452_v48 = vsel %vm445_vm4, %v5865_v7, %v2530_v56  ;;  %v2470_v16 = vunpack.i.h.bf16 %v5866_v0  ;;  %v2469_v46 = vunpack.i.l.bf16 %v5866_v0  ;;  %v3102_v52 = vld [vmem:[%s5632_s0 + $0x10] sm:$0xff]  ;;  %v5870_v7 = vld [vmem:[#allocation19_spill] sm:$0xff] }
 0x16a   :  { %845 = vmatpush.msrb.mxu1 %v5864_v33  ;;  %882 = vmatpush.msrb.mxu0 %v233_v39  ;;  %v416_v25 = vsel %vm5701_vm3, %v5868_v34, %v2510_v22  ;;  %v306_v39 = vsel %vm301_vm12, %v2444_v2, %v2445_v63  ;;  %v380_v33 = vsel %vm373_vm9, %v2489_v40, %v2490_v54 }
 0x16b   :  { %918 = vmatpush.msrb.mxu2 %v378_v58  ;;  %996 = vmatpush.msra.mxu3 %v452_v48  ;;  %v2385_v58 = vunpack.i.h.bf16 %v5856_v9  ;;  %v5700_v48 = vunpack.i.h.bf16 %v5870_v7  ;;  %v595_v2 = vsel %vm589_vm6, %v2600_v21, %v2629_v44  ;;  %v344_v12 = vsel %vm337_vm10, %v2469_v46, %v2470_v16 }
 0x16c   :  { %846 = vmatpush.msrb.mxu1 %v5867_v55  ;;  %883 = vmatpush.msrb.mxu0 %v197_v11  ;;  %v2429_v11 = vunpack.i.l.bf16 %v5870_v7  ;;  %v5871_v55 = vld [vmem:[#allocation26_spill] sm:$0xff]  ;;  %v559_v21 = vsel %vm553_vm7, %v2590_v18, %v2604_v28  ;;  %v2645_v44 = vunpack.i.h.bf16 %v3884_v6  ;;  %v4177_v18 = vpop.permute.xlu2 %2662  ;;  %v523_v28 = vsel %vm517_vm8, %v2565_v19, %v2569_v5 }
 0x16d   :  { %919 = vmatpush.msrb.mxu2 %v342_v13  ;;  %997 = vmatpush.msra.mxu3 %v416_v25  ;;  %v2450_v13 = vunpack.i.h.bf16 %v5871_v55  ;;  %v2449_v34 = vunpack.i.l.bf16 %v5871_v55  ;;  %v5872_v25 = vld [vmem:[#allocation23_spill] sm:$0xff]  ;;  %v2409_v19 = vunpack.i.l.bf16 %v5874_v20  ;;  %v2655_v5 = vunpack.i.h.bf16 %v3947_v1 }
 0x16e   :  { %847 = vmatpush.msrb.mxu1 %v3102_v52  ;;  %884 = vmatpush.msrb.mxu0 %v5869_v23  ;;  %v270_v52 = vsel %vm265_vm11, %v2424_v31, %v2425_v10  ;;  %v5873_v23 = vld [vmem:[#allocation33_spill] sm:$0xff]  ;;  %v234_v31 = vsel %vm5767_vm14, %v2404_v47, %v2405_v32  ;;  %v2650_v47 = vunpack.i.h.bf16 %v3895_v14  ;;  %v272_v27 = vsel %vm265_vm11, %v2429_v11, %v5700_v48  ;;  %v5900_v48 = vld [vmem:[#allocation43_spill] sm:$0xff] }
 0x16f   :  { %920 = vmatpush.msrb.mxu2 %v306_v39  ;;  %998 = vmatpush.msra.mxu3 %v380_v33  ;;  %v308_v39 = vsel %vm301_vm12, %v2449_v34, %v2450_v13  ;;  %v5699_v33 = vunpack.i.h.bf16 %v5874_v20  ;;  %v379_v1 = vsel %vm373_vm9, %v2485_v35, %v2489_v40  ;;  %v343_v35 = vsel %vm337_vm10, %v2465_v45, %v2469_v46 }
 0x170   :  { %952 = vmatpush.msra.mxu1 %v595_v2  ;;  %885 = vmatpush.msrb.mxu0 %v5872_v25  ;;  %v3103_v2 = vld [vmem:[%s5632_s0 + $0x18] sm:$0xff]  ;;  %v198_v25 = vsel %vm5737_vm15, %v2384_v62, %v2385_v58  ;;  %v5876_v62 = vld [vmem:[#allocation16_spill] sm:$0xff]  ;;  %v699_v6 = vsel %vm679_vm13, %v2649_v41, %v2650_v47  ;;  %v2665_v41 = vunpack.i.h.bf16 %v4177_v18  ;;  %v307_v43 = vsel %vm301_vm12, %v2445_v63, %v2449_v34  ;;  %v3105_v63 = vld [vmem:[%s5632_s0 + $0x30] sm:$0xff] }
 0x171   :  { %921 = vmatpush.msrb.mxu2 %v270_v52  ;;  %999 = vmatpush.msra.mxu3 %v344_v12  ;;  %v707_v52 = vsel %vm679_vm13, %v2644_v42, %v2645_v44  ;;  %v5875_v12 = vld [vmem:[#allocation49_spill] sm:$0xff]  ;;  %v5878_v42 = vld [vmem:[#allocation47_spill] sm:$0xff]  ;;  %v271_v46 = vsel %vm265_vm11, %v2425_v10, %v2429_v11  ;;  %v235_v34 = vsel %vm5767_vm14, %v2405_v32, %v2409_v19 }
 0x172   :  { %953 = vmatpush.msra.mxu1 %v559_v21  ;;  %886 = vmatpush.msrb.mxu0 %v5873_v23  ;;  %v5698_v21 = vunpack.i.h.bf16 %v5876_v62  ;;  %v2389_v23 = vunpack.i.l.bf16 %v5876_v62 }
 0x173   :  { %922 = vmatpush.msrb.mxu2 %v234_v31  ;;  %1000 = vmatpush.msra.mxu3 %v308_v39  ;;  %v5877_v31 = vld [vmem:[#allocation28_spill] sm:$0xff]  ;;  %v236_v39 = vsel %vm5767_vm14, %v2409_v19, %v5699_v33  ;;  %v5885_v19 = vld [vmem:[#allocation31_spill] sm:$0xff] }
 0x174   :  { %954 = vmatpush.msra.mxu1 %v523_v28  ;;  %887 = vmatpush.msrb.mxu0 %v3103_v2  ;;  %v2660_v28 = vunpack.i.h.bf16 %v3944_v60  ;;  %v5879_v2 = vld [vmem:[#allocation24_spill] sm:$0xff]  ;;  %v2673_v60 = vpop.permute.xlu1 %2672  ;;  %v199_v10 = vsel %vm5737_vm15, %v2385_v58, %v2389_v23 }
 0x175   :  { %923 = vmatpush.msrb.mxu2 %v198_v25  ;;  %1001 = vmatpush.msra.mxu3 %v272_v27  ;;  %v200_v25 = vsel %vm5737_vm15, %v2389_v23, %v5698_v21  ;;  %v4220_v27 = vpop.permute.xlu0 %2667  ;;  %v5886_v23 = vld [vmem:[#allocation32_spill] sm:$0xff] }
 0x176   :  { %888 = vmatmul.f32.vlgmr.msrb.gmra.mxu0 %v3887_v36  ;;  %955 = vmatpush.msra.mxu1 %v5875_v12  ;;  %v5880_v12 = vld [vmem:[#allocation46_spill] sm:$0xff]  ;;  %v683_v14 = vsel %vm679_vm13, %v2659_v49, %v2660_v28  ;;  %v2669_v49 = vunpack.i.l.bf16 %v4220_v27  ;;  %v2670_v40 = vunpack.i.h.bf16 %v4220_v27 }
 0x177   :  { %904 = vmatpush.msra.mxu0 %v707_v52  ;;  %924 = vmatpush.msrb.mxu2 %v5877_v31  ;;  %v691_v52 = vsel %vm679_vm13, %v2654_v51, %v2655_v5  ;;  %v2664_v31 = vunpack.i.l.bf16 %v4177_v18  ;;  %v5882_v51 = vld [vmem:[#allocation37_spill] sm:$0xff] }
 0x178   :  { %1002 = vmatpush.msra.mxu3 %v236_v39  ;;  %956 = vmatpush.msra.mxu1 %v5878_v42  ;;  %v5881_v39 = vld [vmem:[#allocation34_spill] sm:$0xff]  ;;  %v3104_v42 = vld [vmem:[%s5632_s0 + $0x20] sm:$0xff]  ;;  %v692_v45 = vsel %vm679_vm13, %v2655_v5, %v2669_v49  ;;  %v684_v37 = vsel %vm679_vm13, %v2660_v28, %v2670_v40 }
 0x179   :  { %905 = vmatpush.msra.mxu0 %v699_v6  ;;  %925 = vmatpush.msrb.mxu2 %v5879_v2  ;;  %v4238_v6 = vpop.permute.xlu2 %2677  ;;  %v708_v18 = vsel %vm679_vm13, %v2645_v44, %v2664_v31  ;;  %v700_v44 = vsel %vm679_vm13, %v2650_v47, %v2665_v41  ;;  %v2674_v2 = vunpack.i.l.bf16 %v2673_v60  ;;  %v2675_v47 = vunpack.i.h.bf16 %v2673_v60 }
 0x17a   :  { %1003 = vmatpush.msra.mxu3 %v200_v25  ;;  %957 = vmatpush.msra.mxu1 %v5880_v12  ;;  %v5884_v25 = vld [vmem:[#allocation35_spill] sm:$0xff]  ;;  %v2679_v11 = vunpack.i.l.bf16 %v4238_v6  ;;  %v2680_v32 = vunpack.i.h.bf16 %v4238_v6  ;;  %v5887_v12 = vld [vmem:[#allocation38_spill] sm:$0xff] }
 0x17b   :  { %906 = vmatpush.msra.mxu0 %v691_v52  ;;  %926 = vmatpush.msrb.mxu2 %v5881_v39  ;;  %v709_v57 = vsel %vm679_vm13, %v2664_v31, %v2674_v2  ;;  %v701_v38 = vsel %vm679_vm13, %v2665_v41, %v2675_v47  ;;  %v3106_v41 = vld [vmem:[%s5632_s0 + $0x28] sm:$0xff] }
 0x17c   :  { %1004 = vmatpush.msra.mxu3 %v5882_v51  ;;  %958 = vmatpush.msra.mxu1 %v379_v1  ;;  %v693_v9 = vsel %vm679_vm13, %v2669_v49, %v2679_v11  ;;  %v685_v28 = vsel %vm679_vm13, %v2670_v40, %v2680_v32  ;;  %v4318_v51 = vld [vmem:[%s5632_s0 + $0x40] sm:$0xff] }
 0x17d   :  { %907 = vmatpush.msra.mxu0 %v683_v14  ;;  %927 = vmatpush.msrb.mxu2 %v3104_v42  ;;  %v5888_v49 = vld [vmem:[#allocation8_spill] sm:$0xff] }
 0x17e   :  { %1005 = vmatpush.msra.mxu3 %v5883_v3  ;;  %2246 = vmatmul.msk.f32.vlgmr.msra.gmra.mxu0 %vm748_vm1, %v3859_v53  ;;  %v5892_v40 = vld [vmem:[#allocation12_spill] sm:$0xff] }
 0x17f   :  { %944 = vmatpush.msrb.mxu0 %v708_v18  ;;  %959 = vmatpush.msra.mxu1 %v343_v35  ;;  %v5889_v18 = vld [vmem:[#allocation10_spill] sm:$0xff]  ;;  %v5891_v35 = vld [vmem:[#allocation9_spill] sm:$0xff] }
 0x180   :  { %1006 = vmatpush.msra.mxu3 %v5884_v25  ;;  %928 = vmatmul.f32.vlgmr.msrb.gmra.mxu2 %v3887_v36  ;;  %v5890_v42 = vunpack.i.h.bf16 %v5889_v18 }
 0x181   :  { %945 = vmatpush.msrb.mxu0 %v700_v44  ;;  %960 = vmatpush.msra.mxu1 %v307_v43  ;;  %v4283_v5 = vpop.permute.xlu2 %2692  ;;  %v2701_v44 = vpack.i.bf16 %v5892_v40, %v5891_v35 }
 0x182   :  { %2245 = vmatmul.msk.f32.vlgmr.msrb.gmra.mxu3 %vm748_vm1, %v3859_v53  ;;  %848 = vmatmul.f32.vlgmr.msrb.gmra.mxu1 %v3887_v36  ;;  %v2694_v58 = vunpack.i.l.bf16 %v4283_v5  ;;  %v2695_v27 = vunpack.i.h.bf16 %v4283_v5  ;;  %v4328_v3 = vsel %vm85_vm0, %v5890_v42, %v5888_v49 }
 0x183   :  { %946 = vmatpush.msrb.mxu0 %v692_v45  ;;  %961 = vmatpush.msra.mxu1 %v271_v46 }
 0x184   :  { %1007 = vmatpush.msra.mxu3 %v3105_v63  ;;  %v710_v52 = vsel %vm679_vm13, %v2674_v2, %v2694_v58  ;;  %v702_v14 = vsel %vm679_vm13, %v2675_v47, %v2695_v27  ;;  %v4335_v2 = vld [vmem:[%s5632_s0 + $0x38] sm:$0xff] }
 0x185   :  { %947 = vmatpush.msrb.mxu0 %v684_v37  ;;  %962 = vmatpush.msra.mxu1 %v235_v34  ;;  %v2696_v25 = vpack.i.bf16 %v4335_v2, %v4328_v3 }
 0x186   :  { %2247 = vmatmul.msk.f32.vlgmr.msrb.gmra.mxu0 %vm748_vm1, %v3859_v53 }
 0x187   :  { %984 = vmatpush.msra.mxu0 %v709_v57  ;;  %963 = vmatpush.msra.mxu1 %v199_v10 }
 0x189   :  { %985 = vmatpush.msra.mxu0 %v701_v38  ;;  %964 = vmatpush.msra.mxu1 %v5885_v19 }
 0x18a   :  { %1008 = vmatmul.f32.vlgmr.msra.gmra.mxu3 %v3887_v36 }
 0x18b   :  { %986 = vmatpush.msra.mxu0 %v693_v9  ;;  %965 = vmatpush.msra.mxu1 %v5886_v23 }
 0x18d   :  { %987 = vmatpush.msra.mxu0 %v685_v28  ;;  %966 = vmatpush.msra.mxu1 %v5887_v12 }
 0x18e   :  { %2248 = vmatmul.msk.f32.vlgmr.msra.gmra.mxu0 %vm748_vm1, %v3859_v53 }
 0x18f   :  { %1024 = vmatpush.msrb.mxu0 %v710_v52  ;;  %967 = vmatpush.msra.mxu1 %v3106_v41 }
 0x190   :  { %968 = vmatmul.f32.vlgmr.msra.gmra.mxu1 %v3887_v36 }
 0x191   :  { %1025 = vmatpush.msrb.mxu0 %v702_v14 }
 0x1cb   :  { %v789_v31 = vpop.f32.mrf.mxu1 }
 0x1d1   :  { %v769_v39 = vpop.f32.mrf.mxu0 }
 0x1d2   :  { %v4313_v1 = vadd.f32 %v789_v31, %v769_v39 }
 0x1d4   :  { %v2686_v60 = vpack.i.bf16 %v4313_v1, %v4318_v51 }
 0x1d6   :  { %2687 = vrot.lane.b32.xlu1 %v2686_v60, %s3176_s27  ;;  %2682 = vrot.lane.b32.xlu0 %v2686_v60, %s3177_s2  ;;  %v4409_v60 = vpop.permute.xlu2 %2707 }
 0x1d7   :  { %v2709_v33 = vunpack.i.l.bf16 %v4409_v60 }
 0x1de   :  { %2702 = vrot.lane.b32.xlu1 %v2701_v44, %s3178_s28  ;;  %2697 = vrot.lane.b32.xlu0 %v2696_v25, %s3178_s28 }
 0x1e0   :  { %v809_v43 = vpop.f32.mrf.mxu2  ;;  %v829_v45 = vpop.f32.mrf.mxu3 }
 0x1e1   :  { %v4341_v46 = vadd.f32 %v829_v45, %v809_v43 }
 0x1e3   :  { %v2716_v47 = vpack.i.bf16 %v4341_v46, %v4313_v1 }
 0x1e5   :  { %2717 = vrot.lane.b32.xlu2 %v2716_v47, %s3164_s16 }
 0x1e6   :  { %2722 = vrot.lane.b32.xlu1 %v2716_v47, %s3165_s17  ;;  %2712 = vrot.lane.b32.xlu0 %v2716_v47, %s3163_s29 }
 0x1ed   :  { %2727 = vrot.lane.b32.xlu2 %v2716_v47, %s3175_s26 }
 0x1ee   :  { %2737 = vrot.lane.b32.xlu1 %v2716_v47, %s3173_s1  ;;  %2732 = vrot.lane.b32.xlu0 %v2716_v47, %s3174_s25 }
 0x1f3   :  { %v889_v37 = vpop.f32.mrf.mxu0 }
 0x1f5   :  { %2742 = vrot.lane.b32.xlu2 %v2716_v47, %s3172_s24 }
 0x1f6   :  { %2752 = vrot.lane.b32.xlu1 %v2716_v47, %s3170_s22  ;;  %2747 = vrot.lane.b32.xlu0 %v2716_v47, %s3171_s23 }
 0x1fb   :  { %v909_v63 = vpop.f32.mrf.mxu0 }
 0x1fc   :  { %v4357_v34 = vadd.f32 %v909_v63, %v889_v37  ;;  %v5897_v37 = vld [vmem:[#allocation50_spill] sm:$0xff] }
 0x1fd   :  { %2757 = vrot.lane.b32.xlu2 %v2716_v47, %s3169_s21 }
 0x1fe   :  { %2767 = vrot.lane.b32.xlu1 %v2716_v47, %s3167_s19  ;;  %2762 = vrot.lane.b32.xlu0 %v2716_v47, %s3168_s20  ;;  %5893 = vst [vmem:[#allocation11_spill] sm:$0xff] %v4357_v34 }
 0x1ff   :  { %v849_v57 = vpop.f32.mrf.mxu1 }
 0x203   :  { %v929_v10 = vpop.f32.mrf.mxu2  ;;  %v949_v38 = vpop.f32.mrf.mxu0 }
 0x204   :  { %v4359_v19 = vadd.f32 %v949_v38, %v929_v10 }
 0x205   :  { %v869_v9 = vpop.f32.mrf.mxu3 }
 0x206   :  { %5894 = vst [vmem:[#allocation21_spill] sm:$0xff] %v4359_v19  ;;  %2777 = vrot.lane.b32.xlu1 %v2716_v47, %s3178_s28  ;;  %2772 = vrot.lane.b32.xlu0 %v2716_v47, %s3166_s18  ;;  %v4363_v23 = vadd.f32 %v869_v9, %v849_v57  ;;  %v2781_v28 = vpack.i.bf16 %v4359_v19, %v4357_v34 }
 0x208   :  { %5895 = vst [vmem:[#allocation30_spill] sm:$0xff] %v4363_v23  ;;  %2782 = vrot.lane.b32.xlu2 %v2781_v28, %s3177_s2  ;;  %v4370_v52 = vpack.i.bf16 %v4357_v34, %v4363_v23  ;;  %v2806_v12 = vpack.i.bf16 %v4363_v23, %v4341_v46 }
 0x20b   :  { %v989_v41 = vpop.f32.mrf.mxu0 }
 0x20d   :  { %v969_v14 = vpop.f32.mrf.mxu1 }
 0x20e   :  { %2787 = vrot.lane.b32.xlu1 %v2781_v28, %s3176_s27  ;;  %2797 = vrot.lane.b32.xlu0 %v4370_v52, %s3164_s16  ;;  %v4395_v31 = vadd.f32 %v989_v41, %v969_v14  ;;  %v5899_v14 = vld [vmem:[#allocation48_spill] sm:$0xff] }
 0x20f   :  { %v453_v50 = vsel %vm445_vm4, %v2530_v56, %v5899_v14 }
 0x210   :  { %2802 = vrot.lane.b32.xlu2 %v4370_v52, %s3165_s17  ;;  %5896 = vst [vmem:[#allocation41_spill] sm:$0xff] %v4395_v31  ;;  %v4399_v39 = vpack.i.bf16 %v4395_v31, %v4359_v19 }
 0x216   :  { %2792 = vrot.lane.b32.xlu1 %v4370_v52, %s3163_s29  ;;  %2807 = vrot.lane.b32.xlu0 %v2806_v12, %s3177_s2 }
 0x218   :  { %2817 = vrot.lane.b32.xlu2 %v4370_v52, %s3175_s26 }
 0x21e   :  { %2812 = vrot.lane.b32.xlu1 %v2806_v12, %s3176_s27  ;;  %2827 = vrot.lane.b32.xlu0 %v4370_v52, %s3173_s1  ;;  %v5898_v12 = vld [vmem:[#allocation45_spill] sm:$0xff] }
 0x21f   :  { %v489_v8 = vsel %vm481_vm5, %v2550_v30, %v5898_v12  ;;  %v417_v30 = vsel %vm5701_vm3, %v2510_v22, %v5900_v48  ;;  %v5907_v22 = vunpack.i.h.bf16 %v5870_v7 }
 0x220   :  { %2832 = vrot.lane.b32.xlu2 %v4370_v52, %s3172_s24 }
 0x226   :  { %2822 = vrot.lane.b32.xlu1 %v4370_v52, %s3174_s25  ;;  %2842 = vrot.lane.b32.xlu0 %v4370_v52, %s3170_s22 }
 0x228   :  { %2847 = vrot.lane.b32.xlu2 %v4370_v52, %s3169_s21 }
 0x22e   :  { %2837 = vrot.lane.b32.xlu1 %v4370_v52, %s3171_s23  ;;  %2852 = vrot.lane.b32.xlu0 %v4370_v52, %s3168_s20 }
 0x230   :  { %2867 = vrot.lane.b32.xlu2 %v4399_v39, %s3163_s29 }
 0x236   :  { %2857 = vrot.lane.b32.xlu1 %v4370_v52, %s3167_s19  ;;  %2877 = vrot.lane.b32.xlu0 %v4399_v39, %s3165_s17 }
 0x238   :  { %2887 = vrot.lane.b32.xlu2 %v4399_v39, %s3174_s25 }
 0x23e   :  { %2862 = vrot.lane.b32.xlu1 %v4370_v52, %s3166_s18  ;;  %2882 = vrot.lane.b32.xlu0 %v4399_v39, %s3175_s26 }
 0x23f   :  { %v4413_v18 = vpop.permute.xlu2 %2717 }
 0x240   :  { %2907 = vrot.lane.b32.xlu2 %v4399_v39, %s3170_s22 }
 0x246   :  { %2897 = vrot.lane.b32.xlu0 %v4399_v39, %s3172_s24  ;;  %2872 = vrot.lane.b32.xlu1 %v4399_v39, %s3164_s16 }
 0x247   :  { %v4417_v42 = vpop.permute.xlu2 %2727 }
 0x248   :  { %v4419_v44 = vpop.permute.xlu1 %2687  ;;  %v4421_v25 = vpop.permute.xlu0 %2682  ;;  %2912 = vrot.lane.b32.xlu2 %v4399_v39, %s3169_s21 }
 0x249   :  { %v2684_v43 = vunpack.i.l.bf16 %v4421_v25  ;;  %v2689_v45 = vunpack.i.l.bf16 %v4419_v44 }
 0x24b   :  { %1072 = vmatpush.msrb.mxu1 %v2684_v43 }
 0x24d   :  { %1073 = vmatpush.msrb.mxu1 %v2689_v45 }
 0x24e   :  { %2892 = vrot.lane.b32.xlu1 %v4399_v39, %s3173_s1 }
 0x24f   :  { %v4427_v47 = vpop.permute.xlu2 %2742  ;;  %1074 = vmatpush.msrb.mxu1 %v5897_v37 }
 0x250   :  { %v2703_v63 = vpop.permute.xlu1 %2702  ;;  %v2698_v57 = vpop.permute.xlu0 %2697  ;;  %2917 = vrot.lane.b32.xlu2 %v4399_v39, %s3168_s20 }
 0x251   :  { %v2705_v10 = vunpack.i.h.bf16 %v2703_v63  ;;  %v2704_v38 = vunpack.i.l.bf16 %v2703_v63  ;;  %v2700_v9 = vunpack.i.h.bf16 %v2698_v57  ;;  %v2699_v28 = vunpack.i.l.bf16 %v2698_v57  ;;  %1075 = vmatpush.msrb.mxu1 %v5898_v12 }
 0x253   :  { %1076 = vmatpush.msrb.mxu1 %v5899_v14  ;;  %v694_v41 = vsel %vm679_vm13, %v2679_v11, %v2699_v28  ;;  %v711_v21 = vsel %vm679_vm13, %v2694_v58, %v2704_v38  ;;  %v686_v63 = vsel %vm679_vm13, %v2680_v32, %v2700_v9  ;;  %v703_v57 = vsel %vm679_vm13, %v2695_v27, %v2705_v10  ;;  %v5901_v58 = vld [vmem:[#allocation22_spill] sm:$0xff] }
 0x254   :  { %1026 = vmatpush.msrb.mxu0 %v694_v41  ;;  %1064 = vmatpush.msra.mxu2 %v711_v21  ;;  %v2710_v11 = vunpack.i.h.bf16 %v4409_v60  ;;  %v597_v21 = vsel %vm589_vm6, %v2630_v61, %v2684_v43  ;;  %v695_v6 = vsel %vm679_vm13, %v2699_v28, %v2709_v33  ;;  %v561_v60 = vsel %vm553_vm7, %v2605_v24, %v2689_v45  ;;  %v5902_v41 = vld [vmem:[#allocation36_spill] sm:$0xff]  ;;  %v5903_v43 = vld [vmem:[#allocation25_spill] sm:$0xff]  ;;  %v5904_v24 = vld [vmem:[#allocation14_spill] sm:$0xff] }
 0x255   :  { %1077 = vmatpush.msrb.mxu1 %v5900_v48  ;;  %v525_v61 = vsel %vm517_vm8, %v2570_v4, %v5897_v37  ;;  %v5905_v4 = vld [vmem:[#allocation17_spill] sm:$0xff]  ;;  %v5906_v37 = vld [vmem:[#allocation15_spill] sm:$0xff]  ;;  %v381_v56 = vsel %vm373_vm9, %v2490_v54, %v5901_v58  ;;  %v345_v26 = vsel %vm337_vm10, %v2470_v16, %v5902_v41  ;;  %v309_v59 = vsel %vm301_vm12, %v2450_v13, %v5903_v43 }
 0x256   :  { %1027 = vmatpush.msrb.mxu0 %v686_v63  ;;  %1065 = vmatpush.msra.mxu2 %v703_v57  ;;  %v687_v17 = vsel %vm679_vm13, %v2700_v9, %v2710_v11  ;;  %v273_v0 = vsel %vm265_vm11, %v5907_v22, %v5904_v24  ;;  %v5908_v48 = vunpack.i.h.bf16 %v5874_v20  ;;  %v5909_v13 = vunpack.i.h.bf16 %v5876_v62  ;;  %v5911_v20 = vld [vmem:[#allocation42_spill] sm:$0xff] }
 0x257   :  { %2249 = vmatmul.msk.f32.vlgmr.msrb.gmra.mxu0 %vm748_vm1, %v3859_v53  ;;  %1078 = vmatpush.msrb.mxu1 %v5901_v58  ;;  %v4458_v27 = vpop.permute.xlu2 %2757  ;;  %v2730_v62 = vunpack.i.h.bf16 %v4417_v42 }
 0x258   :  { %1032 = vmatpush.msra.mxu0 %v597_v21  ;;  %v4454_v32 = vpop.permute.xlu1 %2722  ;;  %v4456_v5 = vpop.permute.xlu0 %2712  ;;  %1066 = vmatpush.msra.mxu2 %v695_v6  ;;  %v237_v55 = vsel %vm5767_vm14, %v5908_v48, %v5905_v4  ;;  %v201_v7 = vsel %vm5737_vm15, %v5909_v13, %v5906_v37  ;;  %v2760_v57 = vunpack.i.h.bf16 %v4458_v27  ;;  %v2744_v48 = vunpack.i.l.bf16 %v4427_v47 }
 0x259   :  { %1079 = vmatpush.msrb.mxu1 %v5902_v41  ;;  %2902 = vrot.lane.b32.xlu1 %v4399_v39, %s3171_s23  ;;  %v2715_v41 = vunpack.i.h.bf16 %v4456_v5 }
 0x25a   :  { %1033 = vmatpush.msra.mxu0 %v561_v60  ;;  %1067 = vmatpush.msra.mxu2 %v687_v17  ;;  %v2685_v60 = vunpack.i.h.bf16 %v4421_v25  ;;  %v2729_v25 = vunpack.i.l.bf16 %v4417_v42 }
 0x25b   :  { %1080 = vmatpush.msrb.mxu1 %v5903_v43  ;;  %2250 = vmatmul.msk.f32.vlgmr.msra.gmra.mxu2 %vm748_vm1, %v3859_v53 }
 0x25c   :  { %1104 = vmatpush.msrb.mxu2 %v2704_v38  ;;  %1034 = vmatpush.msra.mxu0 %v525_v61 }
 0x25d   :  { %1081 = vmatpush.msrb.mxu1 %v5904_v24  ;;  %2922 = vrot.lane.b32.xlu2 %v4399_v39, %s3167_s19 }
 0x25e   :  { %1105 = vmatpush.msrb.mxu2 %v2705_v10  ;;  %1035 = vmatpush.msra.mxu0 %v489_v8 }
 0x25f   :  { %1082 = vmatpush.msrb.mxu1 %v5905_v4  ;;  %v2690_v4 = vunpack.i.h.bf16 %v4419_v44 }
 0x260   :  { %1106 = vmatpush.msrb.mxu2 %v2709_v33  ;;  %1036 = vmatpush.msra.mxu0 %v453_v50  ;;  %v4486_v45 = vpop.permute.xlu1 %2737  ;;  %v4488_v15 = vpop.permute.xlu0 %2732  ;;  %v5910_v33 = vld [vmem:[#allocation40_spill] sm:$0xff] }
 0x261   :  { %1083 = vmatpush.msrb.mxu1 %v5906_v37  ;;  %v2739_v44 = vunpack.i.l.bf16 %v4486_v45 }
 0x262   :  { %1107 = vmatpush.msrb.mxu2 %v2710_v11  ;;  %1037 = vmatpush.msra.mxu0 %v417_v30  ;;  %v4497_v29 = vpop.permute.xlu2 %2782  ;;  %v2740_v30 = vunpack.i.h.bf16 %v4486_v45 }
 0x263   :  { %1084 = vmatpush.msrb.mxu1 %v5891_v35  ;;  %2251 = vmatmul.msk.f32.vlgmr.msrb.gmra.mxu2 %vm748_vm1, %v3859_v53 }
 0x264   :  { %1038 = vmatpush.msra.mxu0 %v381_v56 }
 0x265   :  { %1085 = vmatpush.msrb.mxu1 %v5892_v40 }
 0x266   :  { %1039 = vmatpush.msra.mxu0 %v345_v26  ;;  %v2735_v26 = vunpack.i.h.bf16 %v4488_v15 }
 0x267   :  { %1086 = vmatpush.msrb.mxu1 %v5888_v49 }
 0x268   :  { %1040 = vmatpush.msra.mxu0 %v309_v59  ;;  %v4518_v53 = vpop.permute.xlu1 %2752  ;;  %v4520_v54 = vpop.permute.xlu0 %2747  ;;  %v2734_v59 = vunpack.i.l.bf16 %v4488_v15 }
 0x269   :  { %1087 = vmatpush.msrb.mxu1 %v4318_v51  ;;  %v2755_v15 = vunpack.i.h.bf16 %v4518_v53  ;;  %v2749_v45 = vunpack.i.l.bf16 %v4520_v54 }
 0x26a   :  { %1041 = vmatpush.msra.mxu0 %v273_v0  ;;  %1088 = vmatmul.f32.vlgmr.msrb.gmra.mxu1 %v3887_v36  ;;  %v4530_v16 = vpop.permute.xlu2 %2802  ;;  %v1547_v0 = vsel %vm517_vm8, %v2729_v25, %v2730_v62 }
 0x26c   :  { %1042 = vmatpush.msra.mxu0 %v237_v55  ;;  %v1513_v55 = vsel %vm481_vm5, %v2734_v59, %v2735_v26 }
 0x26e   :  { %1043 = vmatpush.msra.mxu0 %v201_v7 }
 0x270   :  { %1044 = vmatpush.msra.mxu0 %v5910_v33  ;;  %v4543_v51 = vpop.permute.xlu1 %2767  ;;  %v4545_v49 = vpop.permute.xlu0 %2762  ;;  %v1479_v33 = vsel %vm445_vm4, %v2739_v44, %v2740_v30 }
 0x271   :  { %v2765_v59 = vunpack.i.h.bf16 %v4545_v49 }
 0x272   :  { %1045 = vmatpush.msra.mxu0 %v5911_v20  ;;  %v4550_v35 = vpop.permute.xlu2 %2817  ;;  %v2750_v20 = vunpack.i.h.bf16 %v4520_v54  ;;  %v2759_v54 = vunpack.i.l.bf16 %v4458_v27  ;;  %v2769_v27 = vunpack.i.l.bf16 %v4543_v51 }
 0x273   :  { %v5711_v40 = vunpack.i.l.bf16 %v4550_v35 }
 0x274   :  { %1046 = vmatpush.msra.mxu0 %v4328_v3  ;;  %v2745_v3 = vunpack.i.h.bf16 %v4427_v47  ;;  %v2754_v47 = vunpack.i.l.bf16 %v4518_v53  ;;  %v2764_v53 = vunpack.i.l.bf16 %v4545_v49  ;;  %v1343_v44 = vsel %vm301_vm12, %v2759_v54, %v2760_v57 }
 0x275   :  { %v4561_v10 = vsel %vm517_vm8, %v2730_v62, %v5711_v40  ;;  %v2719_v54 = vunpack.i.l.bf16 %v4413_v18 }
 0x276   :  { %1047 = vmatpush.msra.mxu0 %v4335_v2  ;;  %v1309_v49 = vsel %vm265_vm11, %v2764_v53, %v2765_v59 }
 0x277   :  { %1048 = vmatmul.f32.vlgmr.msra.gmra.mxu0 %v3887_v36 }
 0x278   :  { %v4564_v38 = vpop.permute.xlu1 %2777  ;;  %v4566_v9 = vpop.permute.xlu0 %2772 }
 0x27a   :  { %v4568_v28 = vpop.permute.xlu2 %2832 }
 0x27b   :  { %v5708_v2 = vunpack.i.l.bf16 %v4568_v28 }
 0x27d   :  { %v4577_v12 = vsel %vm5701_vm3, %v2745_v3, %v5708_v2 }
 0x280   :  { %v4579_v14 = vpop.permute.xlu1 %2787  ;;  %v4581_v36 = vpop.permute.xlu0 %2797 }
 0x282   :  { %v4583_v63 = vpop.permute.xlu2 %2847 }
 0x283   :  { %5912 = vst [vmem:[#allocation44_spill] sm:$0xff] %v4583_v63  ;;  %v5704_v11 = vunpack.i.l.bf16 %v4583_v63 }
 0x285   :  { %v4590_v21 = vsel %vm301_vm12, %v2760_v57, %v5704_v11  ;;  %v5720_v57 = vunpack.i.h.bf16 %v4454_v32  ;;  %v5716_v11 = vunpack.i.h.bf16 %v4550_v35 }
 0x288   :  { %v4592_v58 = vpop.permute.xlu1 %2792  ;;  %v4594_v6 = vpop.permute.xlu0 %2807 }
 0x289   :  { %v5717_v17 = vunpack.i.l.bf16 %v4592_v58  ;;  %v2809_v61 = vunpack.i.l.bf16 %v4594_v6 }
 0x28b   :  { %v1615_v43 = vsel %vm589_vm6, %v2685_v60, %v2809_v61  ;;  %v4608_v8 = vsel %vm85_vm0, %v2715_v41, %v5717_v17 }
 0x28c   :  { %1770 = vmatpush.msra.mxu2 %v1615_v43  ;;  %v1445_v43 = vsel %vm5701_vm3, %v2744_v48, %v2745_v3  ;;  %v1377_v3 = vsel %vm337_vm10, %v2754_v47, %v2755_v15  ;;  %v2724_v47 = vunpack.i.l.bf16 %v4454_v32  ;;  %vm5915_vm3 = vcmask 1031168  }
 0x290   :  { %v4611_v24 = vpop.permute.xlu1 %2812  ;;  %v4613_v50 = vpop.permute.xlu0 %2827 }
 0x291   :  { %v2814_v37 = vunpack.i.l.bf16 %v4611_v24  ;;  %v5709_v56 = vunpack.i.l.bf16 %v4613_v50  ;;  %v5732_v34 = vunpack.i.h.bf16 %v4613_v50 }
 0x293   :  { %v1581_v42 = vsel %vm553_vm7, %v2690_v4, %v2814_v37  ;;  %v4627_v22 = vsel %vm445_vm4, %v2740_v30, %v5709_v56  ;;  %v1411_v30 = vsel %vm373_vm9, %v2749_v45, %v2750_v20 }
 0x294   :  { %1771 = vmatpush.msra.mxu2 %v1581_v42 }
 0x296   :  { %1772 = vmatpush.msra.mxu2 %v1547_v0  ;;  %v2770_v0 = vunpack.i.h.bf16 %v4543_v51 }
 0x298   :  { %v4634_v13 = vpop.permute.xlu1 %2822  ;;  %v4636_v7 = vpop.permute.xlu0 %2842  ;;  %1773 = vmatpush.msra.mxu2 %v1513_v55 }
 0x299   :  { %v5710_v62 = vunpack.i.l.bf16 %v4634_v13  ;;  %v5706_v60 = vunpack.i.l.bf16 %v4636_v7 }
 0x29a   :  { %1774 = vmatpush.msra.mxu2 %v1479_v33  ;;  %v2774_v33 = vunpack.i.l.bf16 %v4566_v9 }
 0x29b   :  { %v4648_v25 = vsel %vm481_vm5, %v2735_v26, %v5710_v62  ;;  %v4653_v4 = vsel %vm337_vm10, %v2755_v15, %v5706_v60  ;;  %v2775_v15 = vunpack.i.h.bf16 %v4566_v9  ;;  %v5714_v9 = vunpack.i.h.bf16 %v4413_v18 }
 0x29c   :  { %1775 = vmatpush.msra.mxu2 %v1445_v43  ;;  %v1275_v43 = vsel %vm5767_vm14, %v2769_v27, %v2770_v0 }
 0x29e   :  { %1776 = vmatpush.msra.mxu2 %v1411_v30 }
 0x2a0   :  { %v4660_v42 = vpop.permute.xlu1 %2837  ;;  %v4662_v26 = vpop.permute.xlu0 %2852  ;;  %1777 = vmatpush.msra.mxu2 %v1377_v3  ;;  %v4695_v3 = vsel %vm157_vm2, %v2724_v47, %v5720_v57 }
 0x2a1   :  { %5913 = vst [vmem:[#allocation20_spill] sm:$0xff] %v4662_v26  ;;  %v5707_v48 = vunpack.i.l.bf16 %v4660_v42  ;;  %v5703_v55 = vunpack.i.l.bf16 %v4662_v26 }
 0x2a2   :  { %1778 = vmatpush.msra.mxu2 %v1343_v44  ;;  %v4701_v44 = vsel %vm5915_vm3, %v2719_v54, %v5714_v9 }
 0x2a3   :  { %v4675_v45 = vsel %vm373_vm9, %v2750_v20, %v5707_v48  ;;  %v4680_v51 = vsel %vm265_vm11, %v2765_v59, %v5703_v55  ;;  %v1241_v20 = vsel %vm5737_vm15, %v2774_v33, %v2775_v15  ;;  %v2714_v59 = vunpack.i.l.bf16 %v4456_v5  ;;  %v4715_v33 = vpop.permute.xlu2 %2867 }
 0x2a4   :  { %1779 = vmatpush.msra.mxu2 %v1309_v49 }
 0x2a5   :  { %v4712_v49 = vsel %vm85_vm0, %v2714_v59, %v2715_v41  ;;  %v5712_v59 = vunpack.i.l.bf16 %v4579_v14 }
 0x2a6   :  { %1780 = vmatpush.msra.mxu2 %v1275_v43 }
 0x2a8   :  { %v4688_v30 = vpop.permute.xlu1 %2857  ;;  %1781 = vmatpush.msra.mxu2 %v1241_v20  ;;  %v4728_v5 = vpop.permute.xlu0 %2877  ;;  %v5713_v20 = vunpack.i.l.bf16 %v4497_v29 }
 0x2a9   :  { %5914 = vst [vmem:[#allocation18_spill] sm:$0xff] %v4688_v30  ;;  %v5702_v53 = vunpack.i.l.bf16 %v4688_v30 }
 0x2aa   :  { %1782 = vmatpush.msra.mxu2 %v4695_v3 }
 0x2ab   :  { %v4706_v27 = vsel %vm5767_vm14, %v2770_v0, %v5702_v53  ;;  %v4726_v54 = vpop.permute.xlu2 %2887  ;;  %v2810_v53 = vunpack.i.h.bf16 %v4594_v6  ;;  %vm5947_vm14 = vmmov %vm5915_vm3 }
 0x2ac   :  { %1783 = vmatpush.msra.mxu2 %v4701_v44 }
 0x2ad   :  { %v4747_v2 = vsel %vm589_vm6, %v2809_v61, %v2810_v53  ;;  %v4757_v62 = vsel %vm589_vm6, %v2810_v53, %v5713_v20 }
 0x2ae   :  { %1784 = vmatpush.msra.mxu2 %v4712_v49 }
 0x2b0   :  { %v4717_v47 = vpop.permute.xlu1 %2862  ;;  %1785 = vmatpush.msra.mxu2 %v4313_v1  ;;  %v2815_v1 = vunpack.i.h.bf16 %v4611_v24  ;;  %v4736_v55 = vpop.permute.xlu0 %2882 }
 0x2b1   :  { %5916 = vst [vmem:[#allocation29_spill] sm:$0xff] %v4717_v47  ;;  %v5705_v43 = vunpack.i.l.bf16 %v4717_v47  ;;  %v1009_v24 = vpop.f32.mrf.mxu3 }
 0x2b2   :  { %v4752_v56 = vsel %vm553_vm7, %v2814_v37, %v2815_v1  ;;  %v4762_v40 = vsel %vm553_vm7, %v2815_v1, %v5712_v59  ;;  %v5723_v1 = vunpack.i.h.bf16 %v4634_v13  ;;  %v5725_v59 = vunpack.i.h.bf16 %v4636_v7 }
 0x2b3   :  { %v4724_v0 = vsel %vm5737_vm15, %v2775_v15, %v5705_v43  ;;  %v4730_v41 = vpop.permute.xlu2 %2907  ;;  %v5715_v15 = vunpack.i.l.bf16 %v4736_v55  ;;  %v5719_v43 = vunpack.i.h.bf16 %v4583_v63  ;;  %vm5933_vm15 = vmmov %vm5915_vm3 }
 0x2b4   :  { %5917 = vst [vmem:[#allocation27_spill] sm:$0xff] %v4730_v41  ;;  %v5724_v17 = vunpack.i.l.bf16 %v4730_v41 }
 0x2b5   :  { %v4769_v6 = vsel %vm517_vm8, %v5716_v11, %v5715_v15  ;;  %v5730_v15 = vunpack.i.h.bf16 %v4662_v26  ;;  %v5722_v11 = vunpack.i.l.bf16 %v4726_v54 }
 0x2b8   :  { %v4778_v53 = vpop.permute.xlu1 %2872 }
 0x2bb   :  { %v4741_v60 = vpop.permute.xlu2 %2912 }
 0x2bc   :  { %5918 = vst [vmem:[#allocation19_spill] sm:$0xff] %v4741_v60  ;;  %v5718_v48 = vunpack.i.l.bf16 %v4741_v60  ;;  %v2799_v60 = vunpack.i.l.bf16 %v4581_v36 }
 0x2be   :  { %v4776_v61 = vsel %vm301_vm12, %v5719_v43, %v5718_v48 }
 0x2bf   :  { %5919 = vst [vmem:[#allocation26_spill] sm:$0xff] %v4776_v61 }
 0x2c0   :  { %v4815_v57 = vpop.permute.xlu1 %2892 }
 0x2c3   :  { %v4784_v9 = vpop.permute.xlu2 %2917 }
 0x2c4   :  { %5920 = vst [vmem:[#allocation23_spill] sm:$0xff] %v4784_v9  ;;  %v5729_v48 = vunpack.i.l.bf16 %v4784_v9 }
 0x2d4   :  { %v1029_v37 = vpop.f32.mrf.mxu0 }
 0x2d5   :  { %v4782_v20 = vadd.f32 %v1029_v37, %v1009_v24  ;;  %v4799_v24 = vsel %vm481_vm5, %v5723_v1, %v5722_v11  ;;  %v4806_v37 = vsel %vm337_vm10, %v5725_v59, %v5724_v17  ;;  %v5731_v1 = vunpack.i.l.bf16 %v4815_v57 }
 0x2d6   :  { %5921 = vst [vmem:[#allocation33_spill] sm:$0xff] %v4806_v37 }
 0x2d7   :  { %v2931_v43 = vpack.i.bf16 %v4782_v20, %v4395_v31  ;;  %v4824_v17 = vsel %vm445_vm4, %v5732_v34, %v5731_v1  ;;  %v5738_v34 = vunpack.i.h.bf16 %v4728_v5 }
 0x2d8   :  { %5923 = vst [vmem:[#allocation49_spill] sm:$0xff] %v4824_v17 }
 0x2d9   :  { %2932 = vrot.lane.b32.xlu2 %v2931_v43, %s3176_s27  ;;  %2927 = vrot.lane.b32.xlu1 %v2931_v43, %s3177_s2  ;;  %v4813_v43 = vsel %vm265_vm11, %v5730_v15, %v5729_v48 }
 0x2da   :  { %5922 = vst [vmem:[#allocation13_spill] sm:$0xff] %v4813_v43  ;;  %v5929_v43 = vunpack.i.h.bf16 %v4413_v18  ;;  %v2805_v18 = vunpack.i.h.bf16 %v4530_v16 }
 0x2de   :  { %v1069_v11 = vpop.f32.mrf.mxu2 }
 0x2e6   :  { %v1109_v23 = vpop.f32.mrf.mxu2 }
 0x2e7   :  { %v1089_v59 = vpop.f32.mrf.mxu1 }
 0x2e8   :  { %v4826_v9 = vadd.f32 %v1109_v23, %v1089_v59  ;;  %v2804_v23 = vunpack.i.l.bf16 %v4530_v16  ;;  %v2874_v16 = vunpack.i.l.bf16 %v4778_v53 }
 0x2ea   :  { %1171 = vrot.lane.b32.xlu0 %v4826_v9, %s3164_s16  ;;  %1137 = vrot.lane.b32.xlu1 %v4826_v9, %s3163_s29 }
 0x2eb   :  { %1205 = vrot.lane.b32.xlu2 %v4826_v9, %s3165_s17 }
 0x2f4   :  { %v1049_v48 = vpop.f32.mrf.mxu0 }
 0x2f5   :  { %v4834_v15 = vadd.f32 %v1069_v11, %v1049_v48  ;;  %v5925_v11 = vunpack.i.h.bf16 %v4454_v32  ;;  %v5926_v32 = vunpack.i.l.bf16 %v4592_v58 }
 0x2f7   :  { %5924 = vst [vmem:[#allocation16_spill] sm:$0xff] %v4834_v15  ;;  %v4838_v1 = vpack.i.bf16 %v4834_v15, %v4782_v20  ;;  %v4856_v48 = vsel %vm157_vm2, %v5925_v11, %v2804_v23 }
 0x2f8   :  { %v2966_v59 = vpack.i.bf16 %v4856_v48, %v4695_v3 }
 0x2f9   :  { %2947 = vrot.lane.b32.xlu1 %v4838_v1, %s3165_s17  ;;  %2942 = vrot.lane.b32.xlu2 %v4838_v1, %s3164_s16 }
 0x2fa   :  { %2937 = vrot.lane.b32.xlu0 %v4838_v1, %s3163_s29 }
 0x301   :  { %2952 = vrot.lane.b32.xlu1 %v4399_v39, %s3166_s18  ;;  %2957 = vrot.lane.b32.xlu2 %v4370_v52, %s3178_s28  ;;  %v2795_v52 = vunpack.i.h.bf16 %v4592_v58  ;;  %v2879_v39 = vunpack.i.l.bf16 %v4728_v5  ;;  %v3001_v58 = vpack.i.bf16 %v4608_v8, %v4712_v49  ;;  %v2800_v49 = vunpack.i.h.bf16 %v4581_v36 }
 0x302   :  { %2977 = vrot.lane.b32.xlu0 %v4838_v1, %s3173_s1  ;;  %v2869_v36 = vunpack.i.l.bf16 %v4715_v33 }
 0x303   :  { %v4872_v3 = vsel %vm85_vm0, %v5926_v32, %v2795_v52  ;;  %v4877_v11 = vsel %vm157_vm2, %v2879_v39, %v5738_v34  ;;  %v2875_v32 = vunpack.i.h.bf16 %v4778_v53 }
 0x304   :  { %5927 = vst [vmem:[#allocation28_spill] sm:$0xff] %v4872_v3  ;;  %v3016_v61 = vpack.i.bf16 %v4872_v3, %v4877_v11 }
 0x305   :  { %5928 = vst [vmem:[#allocation47_spill] sm:$0xff] %v4877_v11 }
 0x309   :  { %2962 = vrot.lane.b32.xlu1 %v4838_v1, %s3175_s26  ;;  %2967 = vrot.lane.b32.xlu2 %v2966_v59, %s3178_s28  ;;  %v4882_v59 = vsel %vm5915_vm3, %v5929_v43, %v2799_v60  ;;  %v4914_v43 = vsel %vm5915_vm3, %v2799_v60, %v2800_v49  ;;  %v4929_v60 = vsel %vm85_vm0, %v2795_v52, %v2869_v36  ;;  %v5742_v52 = vunpack.i.h.bf16 %v4579_v14 }
 0x30a   :  { %2987 = vrot.lane.b32.xlu0 %v4838_v1, %s3171_s23  ;;  %v2996_v41 = vpack.i.bf16 %v4882_v59, %v4701_v44  ;;  %v4901_v44 = vsel %vm157_vm2, %v2804_v23, %v2805_v18  ;;  %5932 = vst [vmem:[#allocation34_spill] sm:$0xff] %v4914_v43  ;;  %v4917_v23 = vsel %vm5933_vm15, %v2800_v49, %v2874_v16  ;;  %v5744_v49 = vunpack.i.h.bf16 %v4715_v33  ;;  %vm5945_vm15 = vmmov %vm5915_vm3 }
 0x30b   :  { %5930 = vst [vmem:[#allocation24_spill] sm:$0xff] %v4901_v44 }
 0x30c   :  { %5934 = vst [vmem:[#allocation37_spill] sm:$0xff] %v4917_v23  ;;  %v4952_v11 = vsel %vm85_vm0, %v2869_v36, %v5744_v49  ;;  %v4971_v36 = vpop.permute.xlu1 %2902 }
 0x30d   :  { %5936 = vst [vmem:[#allocation35_spill] sm:$0xff] %v4929_v60 }
 0x30e   :  { %5939 = vst [vmem:[#allocation38_spill] sm:$0xff] %v4952_v11 }
 0x311   :  { %3017 = vrot.lane.b32.xlu1 %v3016_v61, %s3178_s28  ;;  %2972 = vrot.lane.b32.xlu2 %v4838_v1, %s3174_s25  ;;  %v4904_v61 = vsel %vm157_vm2, %v2805_v18, %v2879_v39  ;;  %v3011_v39 = vpack.i.bf16 %v4917_v23, %v4914_v43  ;;  %v4932_v18 = vsel %vm5915_vm3, %v2874_v16, %v2875_v32  ;;  %v4997_v23 = vpop.permute.xlu0 %2897 }
 0x312   :  { %2997 = vrot.lane.b32.xlu0 %v2996_v41, %s3178_s28  ;;  %5931 = vst [vmem:[#allocation46_spill] sm:$0xff] %v4904_v61  ;;  %v3006_v41 = vpack.i.bf16 %v4904_v61, %v4901_v44  ;;  %v3021_v53 = vpack.i.bf16 %v4932_v18, %v4929_v60  ;;  %v3026_v60 = vpack.i.bf16 %v4359_v19, %v4952_v11  ;;  %v5760_v11 = vunpack.i.h.bf16 %v4564_v38 }
 0x313   :  { %5937 = vst [vmem:[#allocation31_spill] sm:$0xff] %v4932_v18 }
 0x319   :  { %3037 = vrot.lane.b32.xlu1 %v4838_v1, %s3168_s20  ;;  %2982 = vrot.lane.b32.xlu2 %v4838_v1, %s3172_s24 }
 0x31a   :  { %3002 = vrot.lane.b32.xlu0 %v3001_v58, %s3178_s28  ;;  %v4926_v58 = vpop.permute.xlu2 %2922 }
 0x31b   :  { %5935 = vst [vmem:[#allocation39_spill] sm:$0xff] %v4926_v58 }
 0x321   :  { %2992 = vrot.lane.b32.xlu2 %v4838_v1, %s3170_s22 }
 0x322   :  { %3007 = vrot.lane.b32.xlu0 %v3006_v41, %s3178_s28  ;;  %v4936_v41 = vpack.i.bf16 %v4826_v9, %v4834_v15 }
 0x329   :  { %3042 = vrot.lane.b32.xlu2 %v4838_v1, %s3167_s19 }
 0x32a   :  { %3012 = vrot.lane.b32.xlu0 %v3011_v39, %s3178_s28 }
 0x331   :  { %3067 = vrot.lane.b32.xlu2 %v4936_v41, %s3176_s27 }
 0x332   :  { %3022 = vrot.lane.b32.xlu0 %v3021_v53, %s3178_s28 }
 0x333   :  { %v4944_v39 = vpop.permute.xlu2 %2932 }
 0x334   :  { %5938 = vst [vmem:[#allocation32_spill] sm:$0xff] %v4944_v39  ;;  %v5743_v16 = vunpack.i.h.bf16 %v4944_v39  ;;  %v2934_v34 = vunpack.i.l.bf16 %v4944_v39 }
 0x336   :  { %v4957_v18 = vsel %vm553_vm7, %v5742_v52, %v2934_v34  ;;  %v4962_v53 = vsel %vm553_vm7, %v2934_v34, %v5743_v16  ;;  %v5750_v16 = vunpack.i.h.bf16 %v4497_v29 }
 0x337   :  { %5940 = vst [vmem:[#allocation8_spill] sm:$0xff] %v4957_v18 }
 0x338   :  { %5941 = vst [vmem:[#allocation10_spill] sm:$0xff] %v4962_v53 }
 0x339   :  { %1545 = vrot.lane.b32.xlu2 %v4826_v9, %s3175_s26 }
 0x33a   :  { %3027 = vrot.lane.b32.xlu0 %v3026_v60, %s3178_s28 }
 0x342   :  { %3032 = vrot.lane.b32.xlu0 %v4838_v1, %s3169_s21 }
 0x345   :  { %v4973_v52 = vpop.permute.xlu2 %1205 }
 0x34a   :  { %3047 = vrot.lane.b32.xlu0 %v4838_v1, %s3166_s18 }
 0x34b   :  { %v4977_v34 = vpop.permute.xlu1 %2927 }
 0x34c   :  { %5942 = vst [vmem:[#allocation9_spill] sm:$0xff] %v4977_v34  ;;  %v5751_v49 = vunpack.i.h.bf16 %v4977_v34  ;;  %v2929_v39 = vunpack.i.l.bf16 %v4977_v34 }
 0x34e   :  { %v4985_v60 = vsel %vm589_vm6, %v5750_v16, %v2929_v39  ;;  %v4990_v53 = vsel %vm589_vm6, %v2929_v39, %v5751_v49 }
 0x34f   :  { %5943 = vst [vmem:[#allocation12_spill] sm:$0xff] %v4985_v60 }
 0x350   :  { %5944 = vst [vmem:[#allocation50_spill] sm:$0xff] %v4990_v53 }
 0x352   :  { %1511 = vrot.lane.b32.xlu0 %v4826_v9, %s3174_s25 }
 0x353   :  { %v2943_v1 = vpop.permute.xlu2 %2942 }
 0x354   :  { %v2945_v44 = vunpack.i.h.bf16 %v2943_v1  ;;  %v2944_v58 = vunpack.i.l.bf16 %v2943_v1  ;;  %v5950_v1 = vunpack.i.h.bf16 %v4728_v5 }
 0x356   :  { %v5021_v63 = vsel %vm5945_vm15, %v2875_v32, %v2944_v58  ;;  %v5024_v17 = vsel %vm5915_vm3, %v2944_v58, %v2945_v44  ;;  %vm5993_vm15 = vcmask 1014784  }
 0x357   :  { %5946 = vst [vmem:[#allocation45_spill] sm:$0xff] %v5024_v17 }
 0x35b   :  { %v4994_v19 = vpop.permute.xlu2 %2957 }
 0x35c   :  { %v5759_v61 = vunpack.i.l.bf16 %v4994_v19  ;;  %v5007_v39 = vpop.permute.xlu1 %1137  ;;  %v1172_v34 = vpop.permute.xlu0 %1171 }
 0x35e   :  { %v5005_v16 = vsel %vm679_vm13, %v5760_v11, %v5759_v61  ;;  %v5770_v61 = vunpack.i.h.bf16 %v4726_v54 }
 0x363   :  { %v5009_v49 = vpop.permute.xlu2 %2967 }
 0x364   :  { %v5768_v53 = vunpack.i.h.bf16 %v5009_v49  ;;  %v2969_v3 = vunpack.i.l.bf16 %v5009_v49 }
 0x366   :  { %v1727_v43 = vsel %vm679_vm13, %v2969_v3, %v5768_v53  ;;  %v5027_v3 = vsel %vm5947_vm14, %v2945_v44, %v1172_v34  ;;  %vm5988_vm14 = vcmask 1006592  }
 0x367   :  { %1802 = vmatpush.msrb.mxu3 %v1727_v43  ;;  %5948 = vst [vmem:[#allocation48_spill] sm:$0xff] %v5027_v3 }
 0x36b   :  { %v2948_v37 = vpop.permute.xlu1 %2947  ;;  %v5016_v26 = vpop.permute.xlu2 %2972 }
 0x36c   :  { %v2950_v11 = vunpack.i.h.bf16 %v2948_v37  ;;  %v2949_v47 = vunpack.i.l.bf16 %v2948_v37  ;;  %v5769_v30 = vunpack.i.l.bf16 %v5016_v26  ;;  %v2938_v18 = vpop.permute.xlu0 %2937 }
 0x36d   :  { %v2939_v60 = vunpack.i.l.bf16 %v2938_v18 }
 0x36e   :  { %v5031_v43 = vsel %vm157_vm2, %v2950_v11, %v4973_v52  ;;  %v5036_v37 = vsel %vm157_vm2, %v5950_v1, %v2949_v47  ;;  %v5039_v53 = vsel %vm157_vm2, %v2949_v47, %v2950_v11  ;;  %v5046_v32 = vsel %vm481_vm5, %v5770_v61, %v5769_v30 }
 0x36f   :  { %5949 = vst [vmem:[#allocation43_spill] sm:$0xff] %v5031_v43  ;;  %v3081_v44 = vpack.i.bf16 %v5027_v3, %v5031_v43  ;;  %v3071_v58 = vpack.i.bf16 %v5024_v17, %v5039_v53  ;;  %v3051_v5 = vpack.i.bf16 %v5021_v63, %v5036_v37  ;;  %v2940_v1 = vunpack.i.h.bf16 %v2938_v18 }
 0x370   :  { %5951 = vst [vmem:[#allocation22_spill] sm:$0xff] %v5039_v53  ;;  %v5953_v30 = vunpack.i.h.bf16 %v4715_v33  ;;  %v5777_v18 = vunpack.i.h.bf16 %v4815_v57  ;;  %v5784_v43 = vunpack.i.h.bf16 %v4971_v36 }
 0x371   :  { %3082 = vrot.lane.b32.xlu2 %v3081_v44, %s3178_s28  ;;  %3052 = vrot.lane.b32.xlu1 %v3051_v5, %s3178_s28  ;;  %v5061_v11 = vsel %vm85_vm0, %v2940_v1, %v5007_v39 }
 0x372   :  { %3072 = vrot.lane.b32.xlu0 %v3071_v58, %s3178_s28  ;;  %5952 = vst [vmem:[#allocation36_spill] sm:$0xff] %v5061_v11  ;;  %v5066_v61 = vsel %vm85_vm0, %v5953_v30, %v2939_v60  ;;  %v3086_v58 = vpack.i.bf16 %v4834_v15, %v5061_v11  ;;  %v5780_v15 = vunpack.i.h.bf16 %v4736_v55 }
 0x373   :  { %v5057_v47 = vpop.permute.xlu1 %2952  ;;  %v3056_v5 = vpack.i.bf16 %v4395_v31, %v5066_v61 }
 0x374   :  { %v5068_v3 = vpop.permute.xlu0 %2977 }
 0x375   :  { %v5776_v44 = vunpack.i.l.bf16 %v5068_v3 }
 0x377   :  { %v5081_v33 = vsel %vm445_vm4, %v5777_v18, %v5776_v44 }
 0x379   :  { %3087 = vrot.lane.b32.xlu2 %v3086_v58, %s3178_s28  ;;  %3057 = vrot.lane.b32.xlu1 %v3056_v5, %s3178_s28 }
 0x37a   :  { %1443 = vrot.lane.b32.xlu0 %v4826_v9, %s3172_s24 }
 0x37b   :  { %v5087_v30 = vpop.permute.xlu1 %2962 }
 0x37c   :  { %v5779_v11 = vunpack.i.l.bf16 %v5087_v30  ;;  %v5091_v17 = vpop.permute.xlu0 %2987 }
 0x37d   :  { %5954 = vst [vmem:[#allocation25_spill] sm:$0xff] %v5091_v17  ;;  %v5783_v44 = vunpack.i.l.bf16 %v5091_v17  ;;  %v3091_v17 = vpack.i.bf16 %v1172_v34, %v4973_v52  ;;  %v3096_v34 = vpack.i.bf16 %v4826_v9, %v5007_v39 }
 0x37e   :  { %v5100_v58 = vsel %vm517_vm8, %v5780_v15, %v5779_v11 }
 0x37f   :  { %v5107_v5 = vsel %vm373_vm9, %v5784_v43, %v5783_v44  ;;  %v2779_v43 = vunpack.i.l.bf16 %v4564_v38 }
 0x381   :  { %1307 = vrot.lane.b32.xlu2 %v4826_v9, %s3168_s20  ;;  %3062 = vrot.lane.b32.xlu1 %v4936_v41, %s3177_s2  ;;  %v5123_v41 = vsel %vm85_vm0, %v2939_v60, %v2940_v1  ;;  %v5138_v1 = vld [vmem:[#allocation4] sm:$0xff]  ;;  %vm5969_vm0 = vcmask 965632  }
 0x382   :  { %1375 = vrot.lane.b32.xlu0 %v4826_v9, %s3170_s22  ;;  %v3076_v52 = vpack.i.bf16 %v4782_v20, %v5123_v41  ;;  %1786 = vmatmul.f32.vlgmr.msra.gmra.mxu2 %v5138_v1  ;;  %vm5978_vm2 = vmmov %vm5969_vm0 }
 0x383   :  { %v5135_v60 = vpop.permute.xlu1 %3017  ;;  %vm5999_vm3 = vmmov %vm5969_vm0 }
 0x384   :  { %v2998_v18 = vpop.permute.xlu0 %2997  ;;  %v3019_v39 = vunpack.i.l.bf16 %v5135_v60 }
 0x385   :  { %v3000_v53 = vunpack.i.h.bf16 %v2998_v18  ;;  %v2999_v11 = vunpack.i.l.bf16 %v2998_v18 }
 0x387   :  { %v1719_v15 = vsel %vm679_vm13, %v2999_v11, %v3000_v53  ;;  %v5955_v11 = vunpack.i.h.bf16 %v4564_v38 }
 0x388   :  { %1803 = vmatpush.msrb.mxu3 %v1719_v15 }
 0x389   :  { %1239 = vrot.lane.b32.xlu2 %v4826_v9, %s3166_s18  ;;  %1477 = vrot.lane.b32.xlu1 %v4826_v9, %s3173_s1 }
 0x38a   :  { %3092 = vrot.lane.b32.xlu0 %v3091_v17, %s3178_s28  ;;  %v1703_v17 = vsel %vm679_vm13, %v2779_v43, %v5955_v11  ;;  %v5956_v43 = vunpack.i.h.bf16 %v5009_v49 }
 0x38c   :  { %v3003_v44 = vpop.permute.xlu0 %3002 }
 0x38d   :  { %v3005_v18 = vunpack.i.h.bf16 %v3003_v44  ;;  %v3004_v31 = vunpack.i.l.bf16 %v3003_v44 }
 0x38f   :  { %v1711_v15 = vsel %vm679_vm13, %v3004_v31, %v3005_v18 }
 0x390   :  { %1804 = vmatpush.msrb.mxu3 %v1711_v15 }
 0x391   :  { %3077 = vrot.lane.b32.xlu1 %v3076_v52, %s3178_s28 }
 0x392   :  { %3097 = vrot.lane.b32.xlu0 %v3096_v34, %s3178_s28  ;;  %1805 = vmatpush.msrb.mxu3 %v1703_v17  ;;  %v3020_v34 = vunpack.i.h.bf16 %v5135_v60  ;;  %s3179_s28 = smov 64  }
 0x394   :  { %1810 = vmatpush.msra.mxu3 %v4747_v2  ;;  %v3008_v31 = vpop.permute.xlu0 %3007 }
 0x395   :  { %v3010_v44 = vunpack.i.h.bf16 %v3008_v31  ;;  %v3009_v38 = vunpack.i.l.bf16 %v3008_v31  ;;  %v2835_v31 = vunpack.i.h.bf16 %v4568_v28 }
 0x396   :  { %1811 = vmatpush.msra.mxu3 %v4752_v56 }
 0x397   :  { %v1728_v52 = vsel %vm679_vm13, %v5956_v43, %v3009_v38  ;;  %v1729_v15 = vsel %vm679_vm13, %v3009_v38, %v3010_v44  ;;  %v1730_v2 = vsel %vm679_vm13, %v3010_v44, %v3019_v39  ;;  %v5960_v44 = vunpack.i.h.bf16 %v4634_v13 }
 0x398   :  { %1812 = vmatpush.msra.mxu3 %v4561_v10  ;;  %1842 = vmatpush.msrb.mxu0 %v1728_v52  ;;  %v5961_v38 = vunpack.i.l.bf16 %v4634_v13  ;;  %v2840_v52 = vunpack.i.h.bf16 %v4660_v42  ;;  %v5965_v13 = vunpack.i.l.bf16 %v4613_v50 }
 0x399   :  { %1882 = vmatpush.msra.mxu1 %v1729_v15  ;;  %1922 = vmatpush.msrb.mxu2 %v1730_v2 }
 0x39a   :  { %1813 = vmatpush.msra.mxu3 %v4648_v25  ;;  %1409 = vrot.lane.b32.xlu1 %v4826_v9, %s3171_s23  ;;  %v1712_v25 = vsel %vm679_vm13, %v3005_v18, %v3020_v34  ;;  %v5957_v18 = vunpack.i.h.bf16 %v4550_v35 }
 0x39c   :  { %1814 = vmatpush.msra.mxu3 %v4627_v22  ;;  %v3013_v10 = vpop.permute.xlu0 %3012 }
 0x39d   :  { %v3015_v56 = vunpack.i.h.bf16 %v3013_v10  ;;  %v3014_v49 = vunpack.i.l.bf16 %v3013_v10 }
 0x39e   :  { %1815 = vmatpush.msra.mxu3 %v4577_v12  ;;  %v5166_v12 = vld [vmem:[#allocation4 + $0x8] sm:$0xff] }
 0x39f   :  { %v1720_v11 = vsel %vm679_vm13, %v3000_v53, %v3014_v49  ;;  %v1721_v17 = vsel %vm679_vm13, %v3014_v49, %v3015_v56  ;;  %2252 = vmatmul.msk.f32.vlgmr.msrb.gmra.mxu3 %vm748_vm1, %v5166_v12 }
 0x3a0   :  { %1816 = vmatpush.msra.mxu3 %v4675_v45  ;;  %1843 = vmatpush.msrb.mxu0 %v1720_v11  ;;  %v2960_v45 = vunpack.i.h.bf16 %v4994_v19 }
 0x3a1   :  { %1883 = vmatpush.msra.mxu1 %v1721_v17  ;;  %v2899_v17 = vunpack.i.l.bf16 %v4997_v23 }
 0x3a2   :  { %1817 = vmatpush.msra.mxu3 %v4653_v4  ;;  %1844 = vmatpush.msrb.mxu0 %v1712_v25 }
 0x3a3   :  { %1341 = vrot.lane.b32.xlu1 %v4826_v9, %s3169_s21 }
 0x3a4   :  { %1818 = vmatpush.msra.mxu3 %v4590_v21  ;;  %v5168_v22 = vpop.permute.xlu0 %3022  ;;  %1845 = vmatpush.msrb.mxu0 %v5005_v16 }
 0x3a5   :  { %v3025_v4 = vunpack.i.h.bf16 %v5168_v22  ;;  %v3024_v53 = vunpack.i.l.bf16 %v5168_v22  ;;  %2253 = vmatmul.msk.f32.vlgmr.msrb.gmra.mxu0 %vm748_vm1, %v5166_v12 }
 0x3a6   :  { %1819 = vmatpush.msra.mxu3 %v4680_v51  ;;  %1850 = vmatpush.msra.mxu0 %v4757_v62  ;;  %v5958_v51 = vunpack.i.l.bf16 %v4550_v35  ;;  %v1515_v35 = vsel %vm481_vm5, %v5961_v38, %v5960_v44  ;;  %v5982_v38 = vld [vmem:[#allocation20_spill] sm:$0xff] }
 0x3a7   :  { %v1713_v21 = vsel %vm679_vm13, %v3020_v34, %v3024_v53  ;;  %v1722_v16 = vsel %vm679_vm13, %v3015_v56, %v3025_v4  ;;  %v5967_v56 = vunpack.i.l.bf16 %v4579_v14  ;;  %v5968_v34 = vunpack.i.l.bf16 %v4568_v28 }
 0x3a8   :  { %1820 = vmatpush.msra.mxu3 %v4706_v27  ;;  %1851 = vmatpush.msra.mxu0 %v4762_v40  ;;  %v1549_v62 = vsel %vm517_vm8, %v5958_v51, %v5957_v18  ;;  %v5959_v27 = vunpack.i.l.bf16 %v4994_v19  ;;  %v5963_v19 = vunpack.i.l.bf16 %v4497_v29  ;;  %v5979_v51 = vld [vmem:[#allocation8_spill] sm:$0xff] }
 0x3a9   :  { %1884 = vmatpush.msra.mxu1 %v1713_v21  ;;  %1923 = vmatpush.msrb.mxu2 %v1722_v16  ;;  %v5974_v21 = vld [vmem:[#allocation49_spill] sm:$0xff]  ;;  %v5975_v16 = vld [vmem:[#allocation44_spill] sm:$0xff] }
 0x3aa   :  { %1821 = vmatpush.msra.mxu3 %v4724_v0  ;;  %1852 = vmatpush.msra.mxu0 %v1549_v62  ;;  %v1705_v40 = vsel %vm679_vm13, %v5959_v27, %v2960_v45  ;;  %v5962_v0 = vunpack.i.h.bf16 %v4497_v29  ;;  %v5966_v29 = vunpack.i.h.bf16 %v4579_v14  ;;  %v5977_v18 = vunpack.i.l.bf16 %v5975_v16  ;;  %v5980_v62 = vld [vmem:[#allocation18_spill] sm:$0xff] }
 0x3ab   :  { %1885 = vmatpush.msra.mxu1 %v1705_v40  ;;  %1273 = vrot.lane.b32.xlu1 %v4826_v9, %s3167_s19  ;;  %v5964_v9 = vunpack.i.h.bf16 %v4613_v50  ;;  %v1447_v50 = vsel %vm5969_vm0, %v5968_v34, %v2835_v31  ;;  %v2860_v27 = vunpack.i.h.bf16 %v5980_v62  ;;  %v5981_v40 = vld [vmem:[#allocation29_spill] sm:$0xff]  ;;  %v5990_v34 = vunpack.i.l.bf16 %v4726_v54  ;;  %vm6005_vm0 = vmmov %vm5988_vm14 }
 0x3ac   :  { %1822 = vmatpush.msra.mxu3 %v4856_v48  ;;  %1853 = vmatpush.msra.mxu0 %v1515_v35  ;;  %v1618_v43 = vsel %vm589_vm6, %v5963_v19, %v5962_v0  ;;  %v5210_v15 = vpop.permute.xlu0 %3027  ;;  %v1584_v49 = vsel %vm553_vm7, %v5967_v56, %v5966_v29  ;;  %v2865_v44 = vunpack.i.h.bf16 %v5981_v40  ;;  %v5983_v35 = vunpack.i.h.bf16 %v5982_v38 }
 0x3ad   :  { %1890 = vmatpush.msrb.mxu1 %v1618_v43  ;;  %v1481_v2 = vsel %vm445_vm4, %v5965_v13, %v5964_v9  ;;  %v3030_v48 = vunpack.i.h.bf16 %v5210_v15  ;;  %v3029_v10 = vunpack.i.l.bf16 %v5210_v15  ;;  %v5984_v0 = vunpack.i.l.bf16 %v5982_v38 }
 0x3ae   :  { %1823 = vmatpush.msra.mxu3 %v4882_v59  ;;  %1854 = vmatpush.msra.mxu0 %v1481_v2  ;;  %v5970_v59 = vunpack.i.l.bf16 %v4660_v42  ;;  %v5972_v42 = vunpack.i.l.bf16 %v4636_v7  ;;  %v5985_v43 = vunpack.i.h.bf16 %v4736_v55  ;;  %v5986_v9 = vunpack.i.l.bf16 %v4736_v55 }
 0x3af   :  { %1891 = vmatpush.msrb.mxu1 %v1584_v49  ;;  %v1714_v11 = vsel %vm679_vm13, %v3024_v53, %v3029_v10  ;;  %v1706_v28 = vsel %vm679_vm13, %v2960_v45, %v3030_v48  ;;  %v2904_v53 = vunpack.i.l.bf16 %v4971_v36  ;;  %v5976_v45 = vunpack.i.h.bf16 %v5975_v16 }
 0x3b0   :  { %1824 = vmatpush.msra.mxu3 %v4608_v8  ;;  %1855 = vmatpush.msra.mxu0 %v1447_v50  ;;  %v1413_v14 = vsel %vm373_vm9, %v5970_v59, %v2840_v52  ;;  %v5241_v8 = vpop.permute.xlu2 %2982  ;;  %v1311_v19 = vsel %vm265_vm11, %v5984_v0, %v5983_v35  ;;  %v1551_v13 = vsel %vm517_vm8, %v5986_v9, %v5985_v43  ;;  %v2900_v2 = vunpack.i.h.bf16 %v4997_v23  ;;  %v5991_v50 = vld [vmem:[#allocation33_spill] sm:$0xff]  ;;  %v6007_v0 = vld [vmem:[#allocation23_spill] sm:$0xff]  ;;  %v6008_v43 = vld [vmem:[#allocation28_spill] sm:$0xff] }
 0x3b1   :  { %1892 = vmatpush.msrb.mxu1 %v4769_v6  ;;  %1924 = vmatpush.msrb.mxu2 %v1714_v11  ;;  %v5971_v6 = vunpack.i.h.bf16 %v4636_v7  ;;  %v1448_v7 = vsel %vm5978_vm2, %v2835_v31, %v2899_v17  ;;  %v1414_v31 = vsel %vm373_vm9, %v2840_v52, %v2904_v53  ;;  %v5987_v29 = vunpack.i.l.bf16 %v5980_v62  ;;  %vm6009_vm2 = vmmov %vm5993_vm15 }
 0x3b2   :  { %1825 = vmatpush.msra.mxu3 %v4341_v46  ;;  %1856 = vmatpush.msra.mxu0 %v1413_v14  ;;  %v5973_v46 = vld [vmem:[#allocation12_spill] sm:$0xff]  ;;  %v5989_v49 = vunpack.i.h.bf16 %v4726_v54  ;;  %v5992_v52 = vunpack.i.l.bf16 %v5981_v40  ;;  %v5994_v59 = vunpack.i.h.bf16 %v4815_v57  ;;  %v5995_v14 = vunpack.i.l.bf16 %v4815_v57  ;;  %v5997_v54 = vld [vmem:[#allocation27_spill] sm:$0xff]  ;;  %v6001_v57 = vld [vmem:[#allocation13_spill] sm:$0xff] }
 0x3b3   :  { %1893 = vmatpush.msrb.mxu1 %v4799_v24  ;;  %1925 = vmatpush.msrb.mxu2 %v1706_v28  ;;  %v1379_v25 = vsel %vm337_vm10, %v5972_v42, %v5971_v6  ;;  %v1345_v24 = vsel %vm301_vm12, %v5977_v18, %v5976_v45  ;;  %v1277_v56 = vsel %vm5988_vm14, %v5987_v29, %v2860_v27  ;;  %v5996_v6 = vld [vmem:[#allocation39_spill] sm:$0xff]  ;;  %v2954_v45 = vunpack.i.l.bf16 %v5057_v47  ;;  %v6000_v18 = vld [vmem:[#allocation24_spill] sm:$0xff]  ;;  %v6004_v40 = vld [vmem:[#allocation34_spill] sm:$0xff] }
 0x3b4   :  { %1857 = vmatpush.msra.mxu0 %v1379_v25  ;;  %2255 = vmatmul.msk.f32.vlgmr.msrb.gmra.mxu2 %vm748_vm1, %v5166_v12  ;;  %v1517_v55 = vsel %vm481_vm5, %v5990_v34, %v5989_v49  ;;  %v1243_v11 = vsel %vm5993_vm15, %v5992_v52, %v2865_v44  ;;  %v1483_v28 = vsel %vm445_vm4, %v5995_v14, %v5994_v59  ;;  %v2924_v42 = vunpack.i.l.bf16 %v5996_v6  ;;  %v6014_v34 = vld [vmem:[#allocation37_spill] sm:$0xff]  ;;  %vm6015_vm14 = vmmov %vm6005_vm0  ;;  %v6016_v52 = vld [vmem:[#allocation35_spill] sm:$0xff] }
 0x3b5   :  { %1930 = vmatpush.msra.mxu2 %v5973_v46  ;;  %1894 = vmatpush.msrb.mxu1 %v5974_v21  ;;  %v2910_v25 = vunpack.i.h.bf16 %v5997_v54  ;;  %v5998_v21 = vld [vmem:[#allocation26_spill] sm:$0xff]  ;;  %v1449_v16 = vsel %vm5999_vm3, %v2899_v17, %v2900_v2  ;;  %v6006_v17 = vunpack.i.l.bf16 %v5997_v54  ;;  %v6013_v29 = vunpack.i.l.bf16 %v6007_v0  ;;  %vm6017_vm15 = vmmov %vm6009_vm2  ;;  %v6018_v59 = vld [vmem:[#allocation11_spill] sm:$0xff] }
 0x3b6   :  { %1858 = vmatpush.msra.mxu0 %v1345_v24  ;;  %1826 = vmatmul.f32.vlgmr.msra.gmra.mxu3 %v5138_v1  ;;  %v6002_v24 = vunpack.i.h.bf16 %v4971_v36  ;;  %v1278_v38 = vsel %vm6005_vm0, %v2860_v27, %v2924_v42  ;;  %v1244_v36 = vsel %vm6009_vm2, %v2865_v44, %v2954_v45  ;;  %v6010_v27 = vld [vmem:[#allocation30_spill] sm:$0xff]  ;;  %v2955_v44 = vunpack.i.h.bf16 %v5057_v47  ;;  %v6019_v14 = vld [vmem:[#allocation47_spill] sm:$0xff] }
 0x3b7   :  { %1931 = vmatpush.msra.mxu2 %v5979_v51  ;;  %1895 = vmatpush.msrb.mxu1 %v1448_v7  ;;  %v6003_v51 = vld [vmem:[#allocation19_spill] sm:$0xff]  ;;  %v1381_v35 = vsel %vm337_vm10, %v6006_v17, %v2910_v25 }
 0x3b8   :  { %1859 = vmatpush.msra.mxu0 %v1311_v19  ;;  %v5295_v46 = vpop.permute.xlu2 %2992  ;;  %v1415_v7 = vsel %vm373_vm9, %v2904_v53, %v6002_v24  ;;  %v2915_v62 = vunpack.i.h.bf16 %v6003_v51  ;;  %v2920_v19 = vunpack.i.h.bf16 %v6007_v0  ;;  %v2925_v53 = vunpack.i.h.bf16 %v5996_v6  ;;  %2254 = vmatmul.msk.f32.vlgmr.msra.gmra.mxu1 %vm748_vm1, %v5166_v12 }
 0x3b9   :  { %1932 = vmatpush.msra.mxu2 %v1551_v13  ;;  %1896 = vmatpush.msrb.mxu1 %v1414_v31  ;;  %v6011_v9 = vunpack.i.l.bf16 %v6003_v51  ;;  %v6012_v31 = vld [vmem:[#allocation46_spill] sm:$0xff] }
 0x3ba   :  { %1860 = vmatpush.msra.mxu0 %v1277_v56  ;;  %v1313_v56 = vsel %vm265_vm11, %v6013_v29, %v2920_v19 }
 0x3bb   :  { %1933 = vmatpush.msra.mxu2 %v1517_v55  ;;  %1897 = vmatpush.msrb.mxu1 %v5991_v50  ;;  %v1347_v13 = vsel %vm301_vm12, %v6011_v9, %v2915_v62  ;;  %v1279_v55 = vsel %vm6015_vm14, %v2924_v42, %v2925_v53  ;;  %v5341_v50 = vpop.permute.xlu0 %3032  ;;  %v6021_v42 = vld [vmem:[#allocation38_spill] sm:$0xff] }
 0x3bc   :  { %1861 = vmatpush.msra.mxu0 %v1243_v11  ;;  %v1245_v11 = vsel %vm6017_vm15, %v2954_v45, %v2955_v44 }
 0x3bd   :  { %1934 = vmatpush.msra.mxu2 %v1483_v28  ;;  %1898 = vmatpush.msrb.mxu1 %v5998_v21  ;;  %v6020_v28 = vld [vmem:[#allocation31_spill] sm:$0xff] }
 0x3be   :  { %1862 = vmatpush.msra.mxu0 %v6000_v18  ;;  %v6022_v18 = vld [vmem:[#allocation21_spill] sm:$0xff] }
 0x3bf   :  { %1935 = vmatpush.msra.mxu2 %v1449_v16  ;;  %1899 = vmatpush.msrb.mxu1 %v6001_v57  ;;  %v5360_v57 = vpop.permute.xlu1 %3037 }
 0x3c0   :  { %1863 = vmatpush.msra.mxu0 %v6004_v40  ;;  %v5335_v49 = vpop.permute.xlu2 %3042 }
 0x3c1   :  { %1936 = vmatpush.msra.mxu2 %v1415_v7  ;;  %1900 = vmatpush.msrb.mxu1 %v1278_v38 }
 0x3c2   :  { %1864 = vmatpush.msra.mxu0 %v6008_v43 }
 0x3c3   :  { %1937 = vmatpush.msra.mxu2 %v1381_v35  ;;  %1901 = vmatpush.msrb.mxu1 %v1244_v36  ;;  %v5354_v16 = vpop.permute.xlu0 %3047 }
 0x3c4   :  { %1865 = vmatpush.msra.mxu0 %v6010_v27 }
 0x3c5   :  { %1902 = vmatpush.msrb.mxu1 %v6012_v31  ;;  %1938 = vmatpush.msra.mxu2 %v1347_v13 }
 0x3c6   :  { %1866 = vmatmul.f32.vlgmr.msra.gmra.mxu0 %v5138_v1 }
 0x3c7   :  { %1903 = vmatpush.msrb.mxu1 %v6014_v34  ;;  %1939 = vmatpush.msra.mxu2 %v1313_v56 }
 0x3c8   :  { %v5351_v21 = vpop.permute.xlu2 %3067 }
 0x3c9   :  { %1904 = vmatpush.msrb.mxu1 %v6016_v52  ;;  %1940 = vmatpush.msra.mxu2 %v1279_v55 }
 0x3cb   :  { %1905 = vmatpush.msrb.mxu1 %v6018_v59  ;;  %1941 = vmatpush.msra.mxu2 %v1245_v11  ;;  %v5362_v24 = vpop.permute.xlu0 %1511 }
 0x3cc   :  { %1906 = vmatmul.f32.vlgmr.msrb.gmra.mxu1 %v5138_v1 }
 0x3cd   :  { %1942 = vmatpush.msra.mxu2 %v6019_v14 }
 0x3cf   :  { %1943 = vmatpush.msra.mxu2 %v6020_v28 }
 0x3d0   :  { %v5358_v45 = vpop.permute.xlu2 %1545 }
 0x3d1   :  { %1944 = vmatpush.msra.mxu2 %v6021_v42  ;;  %v6024_v42 = vld [vmem:[#allocation10_spill] sm:$0xff] }
 0x3d3   :  { %1945 = vmatpush.msra.mxu2 %v6022_v18 }
 0x3d4   :  { %1946 = vmatmul.f32.vlgmr.msra.gmra.mxu2 %v5138_v1 }
 0x3d8   :  { %v3083_v7 = vpop.permute.xlu2 %3082 }
 0x3d9   :  { %v3084_v43 = vunpack.i.l.bf16 %v3083_v7  ;;  %v3085_v13 = vunpack.i.h.bf16 %v3083_v7 }
 0x3e3   :  { %v3053_v40 = vpop.permute.xlu1 %3052 }
 0x3e4   :  { %v3055_v38 = vunpack.i.h.bf16 %v3053_v40  ;;  %v3054_v17 = vunpack.i.l.bf16 %v3053_v40  ;;  %v3073_v35 = vpop.permute.xlu0 %3072 }
 0x3e5   :  { %v3075_v36 = vunpack.i.h.bf16 %v3073_v35  ;;  %v3074_v27 = vunpack.i.l.bf16 %v3073_v35  ;;  %v3044_v35 = vunpack.i.l.bf16 %v5335_v49 }
 0x3e6   :  { %v1731_v9 = vsel %vm679_vm13, %v3019_v39, %v3054_v17  ;;  %v1723_v56 = vsel %vm679_vm13, %v3025_v4, %v3055_v38  ;;  %v6023_v4 = vld [vmem:[#allocation50_spill] sm:$0xff] }
 0x3e7   :  { %1962 = vmatpush.msrb.mxu3 %v1731_v9  ;;  %v1732_v31 = vsel %vm679_vm13, %v3054_v17, %v3074_v27  ;;  %v1733_v29 = vsel %vm679_vm13, %v3074_v27, %v3084_v43  ;;  %v1724_v34 = vsel %vm679_vm13, %v3055_v38, %v3075_v36  ;;  %v1725_v55 = vsel %vm679_vm13, %v3075_v36, %v3085_v13  ;;  %v3088_v17 = vpop.permute.xlu2 %3087 }
 0x3e8   :  { %2002 = vmatpush.msrb.mxu0 %v1732_v31  ;;  %2042 = vmatpush.msra.mxu1 %v1733_v29  ;;  %v3089_v36 = vunpack.i.l.bf16 %v3088_v17 }
 0x3e9   :  { %1963 = vmatpush.msrb.mxu3 %v1723_v56  ;;  %v3090_v56 = vunpack.i.h.bf16 %v3088_v17 }
 0x3ea   :  { %2003 = vmatpush.msrb.mxu0 %v1724_v34  ;;  %2043 = vmatpush.msra.mxu1 %v1725_v55 }
 0x3eb   :  { %v3058_v60 = vpop.permute.xlu1 %3057 }
 0x3ec   :  { %v5374_v39 = vpop.permute.xlu0 %1443  ;;  %v3060_v52 = vunpack.i.h.bf16 %v3058_v60  ;;  %v3059_v11 = vunpack.i.l.bf16 %v3058_v60  ;;  %v3069_v60 = vunpack.i.l.bf16 %v5351_v21 }
 0x3ee   :  { %v1715_v59 = vsel %vm679_vm13, %v3029_v10, %v3059_v11  ;;  %v1707_v22 = vsel %vm679_vm13, %v3030_v48, %v3060_v52  ;;  %v2984_v10 = vunpack.i.l.bf16 %v5241_v8  ;;  %v2994_v48 = vunpack.i.l.bf16 %v5295_v46 }
 0x3ef   :  { %1964 = vmatpush.msrb.mxu3 %v1715_v59 }
 0x3f0   :  { %v1450_v7 = vsel %vm5999_vm3, %v2900_v2, %v2984_v10  ;;  %v1382_v23 = vsel %vm337_vm10, %v2910_v25, %v2994_v48  ;;  %v3049_v25 = vunpack.i.l.bf16 %v5354_v16 }
 0x3f1   :  { %1965 = vmatpush.msrb.mxu3 %v1707_v22 }
 0x3f2   :  { %2256 = vmatmul.msk.f32.vlgmr.msrb.gmra.mxu3 %vm748_vm1, %v5166_v12  ;;  %v1246_v6 = vsel %vm6009_vm2, %v2955_v44, %v3049_v25 }
 0x3f3   :  { %1970 = vmatpush.msra.mxu3 %v6023_v4  ;;  %v5385_v14 = vpop.permute.xlu1 %3062  ;;  %v2965_v4 = vunpack.i.h.bf16 %v5087_v30 }
 0x3f4   :  { %v5387_v28 = vpop.permute.xlu0 %1375  ;;  %v3064_v51 = vunpack.i.l.bf16 %v5385_v14  ;;  %v3065_v34 = vunpack.i.h.bf16 %v5385_v14  ;;  %v6025_v14 = vld [vmem:[#allocation9_spill] sm:$0xff] }
 0x3f5   :  { %1971 = vmatpush.msra.mxu3 %v6024_v42  ;;  %v6026_v42 = vunpack.i.h.bf16 %v6025_v14  ;;  %v1554_v17 = vsel %vm517_vm8, %v2965_v4, %v5358_v45 }
 0x3f6   :  { %v1622_v44 = vsel %vm589_vm6, %v3064_v51, %v3065_v34 }
 0x3f7   :  { %1972 = vmatpush.msra.mxu3 %v5100_v58  ;;  %v3034_v58 = vunpack.i.l.bf16 %v5341_v50  ;;  %v1621_v47 = vsel %vm589_vm6, %v6026_v42, %v3064_v51  ;;  %vm6035_vm6 = vmmov %vm5999_vm3  ;;  %v3040_v51 = vunpack.i.h.bf16 %v5360_v57 }
 0x3f9   :  { %1973 = vmatpush.msra.mxu3 %v5046_v32  ;;  %v3039_v32 = vunpack.i.l.bf16 %v5360_v57 }
 0x3fb   :  { %1974 = vmatpush.msra.mxu3 %v5081_v33  ;;  %v5394_v15 = vpop.permute.xlu1 %1477  ;;  %v1314_v54 = vsel %vm265_vm11, %v2920_v19, %v3039_v32 }
 0x3fc   :  { %v3093_v18 = vpop.permute.xlu0 %3092 }
 0x3fd   :  { %v3095_v40 = vunpack.i.h.bf16 %v3093_v18  ;;  %v3094_v38 = vunpack.i.l.bf16 %v3093_v18  ;;  %1975 = vmatpush.msra.mxu3 %v1450_v7  ;;  %v6027_v18 = vld [vmem:[#allocation32_spill] sm:$0xff] }
 0x3fe   :  { %v6028_v7 = vunpack.i.h.bf16 %v6027_v18 }
 0x3ff   :  { %1976 = vmatpush.msra.mxu3 %v5107_v5  ;;  %v1734_v33 = vsel %vm679_vm13, %v3084_v43, %v3094_v38  ;;  %v1726_v2 = vsel %vm679_vm13, %v3085_v13, %v3095_v40  ;;  %v1348_v5 = vsel %vm301_vm12, %v2915_v62, %v3034_v58  ;;  %v1280_v62 = vsel %vm6005_vm0, %v2925_v53, %v3044_v35 }
 0x400   :  { %2082 = vmatpush.msrb.mxu2 %v1734_v33  ;;  %v1587_v40 = vsel %vm553_vm7, %v6028_v7, %v3069_v60  ;;  %v6029_v33 = vunpack.i.l.bf16 %v5087_v30 }
 0x401   :  { %1977 = vmatpush.msra.mxu3 %v1382_v23 }
 0x402   :  { %2083 = vmatpush.msrb.mxu2 %v1726_v2  ;;  %v1553_v23 = vsel %vm517_vm8, %v6029_v33, %v2965_v4  ;;  %v6030_v2 = vunpack.i.l.bf16 %v5016_v26  ;;  %vm6040_vm8 = vmmov %vm6009_vm2 }
 0x403   :  { %1978 = vmatpush.msra.mxu3 %v1348_v5  ;;  %v3078_v43 = vpop.permute.xlu1 %3077 }
 0x404   :  { %v3098_v27 = vpop.permute.xlu0 %3097  ;;  %v3080_v9 = vunpack.i.h.bf16 %v3078_v43  ;;  %v3079_v13 = vunpack.i.l.bf16 %v3078_v43  ;;  %v6031_v43 = vld [vmem:[#allocation41_spill] sm:$0xff] }
 0x405   :  { %v3100_v31 = vunpack.i.h.bf16 %v3098_v27  ;;  %v3099_v29 = vunpack.i.l.bf16 %v3098_v27  ;;  %1979 = vmatpush.msra.mxu3 %v1314_v54  ;;  %v6032_v54 = vld [vmem:[#allocation25_spill] sm:$0xff]  ;;  %v2995_v27 = vunpack.i.h.bf16 %v5295_v46 }
 0x406   :  { %v1716_v0 = vsel %vm679_vm13, %v3059_v11, %v3079_v13  ;;  %v1717_v19 = vsel %vm679_vm13, %v3079_v13, %v3089_v36  ;;  %v1708_v53 = vsel %vm679_vm13, %v3060_v52, %v3080_v9  ;;  %v3070_v11 = vunpack.i.h.bf16 %v5351_v21 }
 0x407   :  { %1980 = vmatpush.msra.mxu3 %v1280_v62  ;;  %2004 = vmatpush.msrb.mxu0 %v1716_v0  ;;  %v1718_v55 = vsel %vm679_vm13, %v3089_v36, %v3099_v29  ;;  %v1709_v59 = vsel %vm679_vm13, %v3080_v9, %v3090_v56  ;;  %v1710_v22 = vsel %vm679_vm13, %v3090_v56, %v3100_v31  ;;  %v2975_v21 = vunpack.i.h.bf16 %v5016_v26  ;;  %v1308_v9 = vpop.permute.xlu2 %1307 }
 0x408   :  { %2044 = vmatpush.msra.mxu1 %v1717_v19  ;;  %2084 = vmatpush.msrb.mxu2 %v1718_v55  ;;  %v1588_v38 = vsel %vm553_vm7, %v3069_v60, %v3070_v11  ;;  %v2990_v36 = vunpack.i.h.bf16 %v6032_v54  ;;  %v3035_v31 = vunpack.i.h.bf16 %v5341_v50  ;;  %v3050_v19 = vunpack.i.h.bf16 %v5354_v16  ;;  %vm6039_vm7 = vmmov %vm6009_vm2  ;;  %v6042_v55 = vld [vmem:[#allocation43_spill] sm:$0xff]  ;;  %v6043_v60 = vld [vmem:[#allocation45_spill] sm:$0xff] }
 0x409   :  { %1981 = vmatpush.msra.mxu3 %v1246_v6  ;;  %2005 = vmatpush.msrb.mxu0 %v1708_v53  ;;  %v1519_v5 = vsel %vm481_vm5, %v6030_v2, %v2975_v21  ;;  %v1520_v30 = vsel %vm481_vm5, %v2975_v21, %v5362_v24  ;;  %vm6034_vm5 = vmmov %vm5999_vm3  ;;  %v6044_v6 = vld [vmem:[#allocation48_spill] sm:$0xff]  ;;  %v2116_v11 = vld [vmem:[%s5635_s3 + $0x10] sm:$0xff] }
 0x40a   :  { %2045 = vmatpush.msra.mxu1 %v1709_v59  ;;  %2085 = vmatpush.msrb.mxu2 %v1710_v22  ;;  %v1349_v62 = vsel %vm301_vm12, %v3034_v58, %v3035_v31  ;;  %v1247_v58 = vsel %vm6039_vm7, %v3049_v25, %v3050_v19  ;;  %v6046_v16 = vld [vmem:[#allocation16_spill] sm:$0xff]  ;;  %v2120_v25 = vld [vmem:[%s5635_s3 + $0x30] sm:$0xff]  ;;  %v1787_v59 = vpop.f32.mrf.mxu2  ;;  %v2115_v22 = vld [vmem:[%s5635_s3 + $0x8] sm:$0xff] }
 0x40b   :  { %1982 = vmatpush.msra.mxu3 %v5036_v37  ;;  %2010 = vmatpush.msra.mxu0 %v1621_v47  ;;  %v2980_v37 = vunpack.i.h.bf16 %v5068_v3  ;;  %v2114_v47 = vld [vmem:[%s5635_s3] sm:$0xff] }
 0x40c   :  { %2050 = vmatpush.msrb.mxu1 %v1622_v44  ;;  %v1410_v52 = vpop.permute.xlu1 %1409  ;;  %2257 = vmatmul.msk.f32.vlgmr.msrb.gmra.mxu0 %vm748_vm1, %v5166_v12 }
 0x40d   :  { %1983 = vmatpush.msra.mxu3 %v5021_v63  ;;  %2011 = vmatpush.msra.mxu0 %v1587_v40  ;;  %v2985_v63 = vunpack.i.h.bf16 %v5241_v8  ;;  %v1486_v26 = vsel %vm445_vm4, %v2980_v37, %v5394_v15  ;;  %v6036_v15 = vunpack.i.l.bf16 %v6032_v54  ;;  %v1418_v29 = vsel %vm373_vm9, %v2990_v36, %v1410_v52 }
 0x40e   :  { %2051 = vmatpush.msrb.mxu1 %v1588_v38  ;;  %2259 = vmatmul.msk.f32.vlgmr.msrb.gmra.mxu2 %vm748_vm1, %v5166_v12  ;;  %v1383_v8 = vsel %vm337_vm10, %v2994_v48, %v2995_v27  ;;  %v1315_v48 = vsel %vm265_vm11, %v3039_v32, %v3040_v51  ;;  %v6041_v32 = vld [vmem:[#allocation22_spill] sm:$0xff] }
 0x40f   :  { %1984 = vmatpush.msra.mxu3 %v5066_v61  ;;  %2012 = vmatpush.msra.mxu0 %v1553_v23  ;;  %v6033_v61 = vunpack.i.l.bf16 %v5068_v3  ;;  %v1451_v13 = vsel %vm6034_vm5, %v2984_v10, %v2985_v63  ;;  %v1452_v3 = vsel %vm6035_vm6, %v2985_v63, %v5374_v39  ;;  %v1384_v39 = vsel %vm337_vm10, %v2995_v27, %v5387_v28  ;;  %v1240_v34 = vpop.permute.xlu2 %1239 }
 0x410   :  { %2052 = vmatpush.msrb.mxu1 %v1554_v17  ;;  %v3045_v10 = vunpack.i.h.bf16 %v5335_v49  ;;  %v1316_v28 = vsel %vm265_vm11, %v3040_v51, %v1308_v9  ;;  %v1248_v57 = vsel %vm6040_vm8, %v3050_v19, %v1240_v34  ;;  %v6045_v49 = vld [vmem:[#allocation36_spill] sm:$0xff]  ;;  %vm2220_vm10 = vcmask 39936  }
 0x411   :  { %1985 = vmatpush.msra.mxu3 %v6031_v43  ;;  %2013 = vmatpush.msra.mxu0 %v1519_v5  ;;  %v1485_v45 = vsel %vm445_vm4, %v6033_v61, %v2980_v37  ;;  %vm6038_vm4 = vmmov %vm6005_vm0 }
 0x412   :  { %2053 = vmatpush.msrb.mxu1 %v1520_v30  ;;  %1986 = vmatmul.f32.vlgmr.msra.gmra.mxu3 %v5138_v1  ;;  %v1281_v50 = vsel %vm6038_vm4, %v3044_v35, %v3045_v10  ;;  %v2121_v35 = vld [vmem:[%s5635_s3 + $0x38] sm:$0xff] }
 0x413   :  { %2014 = vmatpush.msra.mxu0 %v1485_v45  ;;  %2258 = vmatmul.msk.f32.vlgmr.msra.gmra.mxu1 %vm748_vm1, %v5166_v12  ;;  %v1417_v12 = vsel %vm373_vm9, %v6036_v15, %v2990_v36  ;;  %vm6037_vm1 = vmmov %vm6005_vm0  ;;  %vm2122_vm9 = vcmask 523264  }
 0x414   :  { %2054 = vmatpush.msrb.mxu1 %v1486_v26  ;;  %2276 = vmatpush.msra.mxu2 %v2121_v35 }
 0x415   :  { %v1342_v24 = vpop.permute.xlu1 %1341  ;;  %2015 = vmatpush.msra.mxu0 %v1451_v13  ;;  %2277 = vmatpush.msrb.mxu3 %v2121_v35 }
 0x416   :  { %2055 = vmatpush.msrb.mxu1 %v1452_v3  ;;  %v1350_v0 = vsel %vm301_vm12, %v3035_v31, %v1342_v24  ;;  %2278 = vmatpush.msra.mxu2 %v2120_v25 }
 0x417   :  { %2016 = vmatpush.msra.mxu0 %v1417_v12  ;;  %2279 = vmatpush.msrb.mxu3 %v2120_v25 }
 0x418   :  { %2056 = vmatpush.msrb.mxu1 %v1418_v29 }
 0x419   :  { %2017 = vmatpush.msra.mxu0 %v1383_v8 }
 0x41a   :  { %2057 = vmatpush.msrb.mxu1 %v1384_v39 }
 0x41b   :  { %2018 = vmatpush.msra.mxu0 %v1349_v62 }
 0x41c   :  { %2058 = vmatpush.msrb.mxu1 %v1350_v0 }
 0x41d   :  { %v1274_v46 = vpop.permute.xlu1 %1273  ;;  %2019 = vmatpush.msra.mxu0 %v1315_v48 }
 0x41e   :  { %v1282_v56 = vsel %vm6037_vm1, %v3045_v10, %v1274_v46  ;;  %2059 = vmatpush.msrb.mxu1 %v1316_v28 }
 0x41f   :  { %2020 = vmatpush.msra.mxu0 %v1281_v50 }
 0x420   :  { %2060 = vmatpush.msrb.mxu1 %v1282_v56 }
 0x421   :  { %2021 = vmatpush.msra.mxu0 %v1247_v58 }
 0x422   :  { %2061 = vmatpush.msrb.mxu1 %v1248_v57  ;;  %v1807_v53 = vpop.f32.mrf.mxu3  ;;  %v1847_v14 = vpop.f32.mrf.mxu0 }
 0x423   :  { %2022 = vmatpush.msra.mxu0 %v6041_v32  ;;  %v1808_v42 = vadd.f32 %v1807_v53, %v1787_v59 }
 0x424   :  { %2062 = vmatpush.msrb.mxu1 %v6042_v55 }
 0x425   :  { %2023 = vmatpush.msra.mxu0 %v6043_v60 }
 0x426   :  { %2063 = vmatpush.msrb.mxu1 %v6044_v6 }
 0x427   :  { %2024 = vmatpush.msra.mxu0 %v5123_v41  ;;  %v2118_v41 = vld [vmem:[%s5635_s3 + $0x20] sm:$0xff] }
 0x428   :  { %2064 = vmatpush.msrb.mxu1 %v6045_v49 }
 0x429   :  { %2025 = vmatpush.msra.mxu0 %v4782_v20  ;;  %v2119_v20 = vld [vmem:[%s5635_s3 + $0x28] sm:$0xff] }
 0x42a   :  { %2065 = vmatpush.msrb.mxu1 %v6046_v16  ;;  %2026 = vmatmul.f32.vlgmr.msra.gmra.mxu0 %v5138_v1 }
 0x42b   :  { %2066 = vmatmul.f32.vlgmr.msrb.gmra.mxu1 %v5138_v1  ;;  %2280 = vmatpush.msra.mxu2 %v2119_v20  ;;  %v2117_v1 = vld [vmem:[%s5635_s3 + $0x18] sm:$0xff] }
 0x42c   :  { %2163 = vmatpush.msra.mxu1 %v2121_v35  ;;  %2281 = vmatpush.msrb.mxu3 %v2119_v20 }
 0x42d   :  { %2282 = vmatpush.msra.mxu2 %v2118_v41 }
 0x42e   :  { %2164 = vmatpush.msra.mxu1 %v2120_v25  ;;  %2283 = vmatpush.msrb.mxu3 %v2118_v41 }
 0x42f   :  { %2284 = vmatpush.msra.mxu2 %v2117_v1 }
 0x430   :  { %2165 = vmatpush.msra.mxu1 %v2119_v20  ;;  %2285 = vmatpush.msrb.mxu3 %v2117_v1 }
 0x431   :  { %2286 = vmatpush.msra.mxu2 %v2116_v11 }
 0x432   :  { %2166 = vmatpush.msra.mxu1 %v2118_v41  ;;  %2287 = vmatpush.msrb.mxu3 %v2116_v11 }
 0x433   :  { %2288 = vmatpush.msra.mxu2 %v2115_v22 }
 0x434   :  { %2167 = vmatpush.msra.mxu1 %v2117_v1  ;;  %2289 = vmatpush.msrb.mxu3 %v2115_v22 }
 0x435   :  { %v1887_v44 = vpop.f32.mrf.mxu1  ;;  %2290 = vmatpush.msra.mxu2 %v2114_v47 }
 0x436   :  { %2168 = vmatpush.msra.mxu1 %v2116_v11  ;;  %2291 = vmatpush.msrb.mxu3 %v2114_v47 }
 0x437   :  { %v1927_v52 = vpop.f32.mrf.mxu2 }
 0x438   :  { %2169 = vmatpush.msra.mxu1 %v2115_v22 }
 0x439   :  { %v1827_v4 = vpop.f32.mrf.mxu3 }
 0x43a   :  { %v1848_v21 = vadd.f32 %v1847_v14, %v1827_v4  ;;  %2170 = vmatpush.msra.mxu1 %v2114_v47 }
 0x43b   :  { %2260 = vmatmul.msk.f32.vlgmr.msra.gmra.mxu1 %vm2122_vm9, %v1808_v42 }
 0x43c   :  { %2262 = vmatmul.msk.f32.vlgmr.msra.gmra.mxu2 %vm2122_vm9, %v1848_v21 }
 0x443   :  { %v1867_v33 = vpop.f32.mrf.mxu0 }
 0x444   :  { %v1888_v2 = vadd.f32 %v1887_v44, %v1867_v33 }
 0x449   :  { %v1907_v18 = vpop.f32.mrf.mxu1 }
 0x44a   :  { %v1928_v7 = vadd.f32 %v1927_v52, %v1907_v18 }
 0x44c   :  { %2100 = vrot.lane.b32.xlu1 %v1928_v7, %s3179_s28 }
 0x454   :  { %2094 = vrot.lane.b32.xlu1 %v1848_v21, %s3179_s28 }
 0x457   :  { %v1947_v40 = vpop.f32.mrf.mxu2 }
 0x475   :  { %v1967_v38 = vpop.f32.mrf.mxu3 }
 0x476   :  { %v1968_v37 = vadd.f32 %v1967_v38, %v1947_v40 }
 0x478   :  { %2103 = vrot.lane.b32.xlu2 %v1968_v37, %s3179_s28 }
 0x489   :  { %v2007_v23 = vpop.f32.mrf.mxu0 }
 0x490   :  { %v2047_v5 = vpop.f32.mrf.mxu1 }
 0x491   :  { %v2087_v43 = vpop.f32.mrf.mxu2 }
 0x495   :  { %v1987_v17 = vpop.f32.mrf.mxu3 }
 0x496   :  { %v2008_v63 = vadd.f32 %v2007_v23, %v1987_v17 }
 0x498   :  { %2106 = vrot.lane.b32.xlu0 %v2008_v63, %s3179_s28 }
 0x4a0   :  { %2097 = vrot.lane.b32.xlu0 %v1888_v2, %s3179_s28 }
 0x4a7   :  { %v2027_v30 = vpop.f32.mrf.mxu0 }
 0x4a8   :  { %v2048_v54 = vadd.f32 %v2047_v5, %v2027_v30  ;;  %v2067_v36 = vpop.f32.mrf.mxu1 }
 0x4a9   :  { %v2088_v61 = vadd.f32 %v2087_v43, %v2067_v36 }
 0x4aa   :  { %2109 = vrot.lane.b32.xlu2 %v2048_v54, %s3179_s28 }
 0x4ab   :  { %2112 = vrot.lane.b32.xlu1 %v2088_v61, %s3179_s28 }
 0x4b2   :  { %2091 = vrot.lane.b32.xlu2 %v1808_v42, %s3179_s28 }
 0x4b8   :  { %v2172_v26 = vpop.f32.mrf.mxu1 }
 0x4b9   :  { %2221 = vst.msk [vmem:[%s5636_s4] sm:$0xff] %vm2220_vm10, %v2172_v26 }
 0x4be   :  { %v2101_v45 = vpop.permute.xlu1 %2100 }
 0x4bf   :  { %2267 = vmatmul.msk.f32.vlgmr.msrb.gmra.mxu3 %vm2122_vm9, %v2101_v45  ;;  %v2178_v9 = vpop.f32.mrf.mxu2 }
 0x4c0   :  { %2223 = vst.msk [vmem:[%s5636_s4 + $0x10] sm:$0xff] %vm2220_vm10, %v2178_v9 }
 0x4c6   :  { %v2095_v27 = vpop.permute.xlu1 %2094 }
 0x4c7   :  { %2263 = vmatmul.msk.f32.gmra.mxu2 %vm2122_vm9, %v2095_v27  ;;  %2268 = vmatmul.msk.f32.gmra.mxu3 %vm2122_vm9, %v1968_v37 }
 0x4cf   :  { %2264 = vmatmul.msk.f32.gmra.mxu2 %vm2122_vm9, %v1888_v2 }
 0x4d2   :  { %v2104_v24 = vpop.permute.xlu2 %2103 }
 0x4d3   :  { %2269 = vmatmul.msk.f32.gmra.mxu3 %vm2122_vm9, %v2104_v24 }
 0x4db   :  { %2270 = vmatmul.msk.f32.gmra.mxu3 %vm2122_vm9, %v2008_v63 }
 0x504   :  { %v2110_v13 = vpop.permute.xlu2 %2109 }
 0x50a   :  { %v2107_v3 = vpop.permute.xlu0 %2106 }
 0x50b   :  { %2271 = vmatmul.msk.f32.gmra.mxu3 %vm2122_vm9, %v2107_v3 }
 0x50c   :  { %v2092_v31 = vpop.permute.xlu2 %2091 }
 0x50d   :  { %2261 = vmatmul.msk.f32.gmra.mxu1 %vm2122_vm9, %v2092_v31 }
 0x512   :  { %v2098_v15 = vpop.permute.xlu0 %2097 }
 0x513   :  { %2265 = vmatmul.msk.f32.gmra.mxu2 %vm2122_vm9, %v2098_v15  ;;  %2272 = vmatmul.msk.f32.gmra.mxu3 %vm2122_vm9, %v2048_v54 }
 0x51b   :  { %2266 = vmatmul.msk.f32.gmra.mxu2 %vm2122_vm9, %v1928_v7  ;;  %2273 = vmatmul.msk.f32.gmra.mxu3 %vm2122_vm9, %v2110_v13 }
 0x51d   :  { %v2113_v12 = vpop.permute.xlu1 %2112 }
 0x523   :  { %2274 = vmatmul.msk.f32.gmra.mxu3 %vm2122_vm9, %v2088_v61 }
 0x52b   :  { %2275 = vmatmul.msk.f32.gmra.mxu3 %vm2122_vm9, %v2113_v12 }
 0x542   :  { %v2193_v29 = vpop.f32.mrf.mxu3 }
 0x543   :  { %2228 = vst.msk [vmem:[%s5636_s4 + $0x38] sm:$0xff] %vm2220_vm10, %v2193_v29 }
 0x54a   :  { %v2181_v51 = vpop.f32.mrf.mxu2  ;;  %v2196_v8 = vpop.f32.mrf.mxu3 }
 0x54b   :  { %2224 = vst.msk [vmem:[%s5636_s4 + $0x18] sm:$0xff] %vm2220_vm10, %v2181_v51 }
 0x54c   :  { %2229 = vst.msk [vmem:[%s5636_s4 + $0x40] sm:$0xff] %vm2220_vm10, %v2196_v8 }
 0x552   :  { %v2184_v39 = vpop.f32.mrf.mxu2 }
 0x553   :  { %2225 = vst.msk [vmem:[%s5636_s4 + $0x20] sm:$0xff] %vm2220_vm10, %v2184_v39 }
 0x556   :  { %v2199_v10 = vpop.f32.mrf.mxu3 }
 0x557   :  { %2230 = vst.msk [vmem:[%s5636_s4 + $0x48] sm:$0xff] %vm2220_vm10, %v2199_v10 }
 0x55e   :  { %v2202_v62 = vpop.f32.mrf.mxu3 }
 0x55f   :  { %2231 = vst.msk [vmem:[%s5636_s4 + $0x50] sm:$0xff] %vm2220_vm10, %v2202_v62 }
 0x58a   :  { %v2175_v0 = vpop.f32.mrf.mxu1 }
 0x58b   :  { %2222 = vst.msk [vmem:[%s5636_s4 + $0x8] sm:$0xff] %vm2220_vm10, %v2175_v0 }
 0x58e   :  { %v2205_v19 = vpop.f32.mrf.mxu3 }
 0x58f   :  { %2232 = vst.msk [vmem:[%s5636_s4 + $0x58] sm:$0xff] %vm2220_vm10, %v2205_v19 }
 0x596   :  { %v2187_v46 = vpop.f32.mrf.mxu2  ;;  %v2208_v48 = vpop.f32.mrf.mxu3 }
 0x597   :  { %2226 = vst.msk [vmem:[%s5636_s4 + $0x28] sm:$0xff] %vm2220_vm10, %v2187_v46 }
 0x598   :  { %2233 = vst.msk [vmem:[%s5636_s4 + $0x60] sm:$0xff] %vm2220_vm10, %v2208_v48 }
 0x59e   :  { %v2190_v28 = vpop.f32.mrf.mxu2  ;;  %v2211_v56 = vpop.f32.mrf.mxu3 }
 0x59f   :  { %2227 = vst.msk [vmem:[%s5636_s4 + $0x30] sm:$0xff] %vm2220_vm10, %v2190_v28 }
 0x5a0   :  { %2234 = vst.msk [vmem:[%s5636_s4 + $0x68] sm:$0xff] %vm2220_vm10, %v2211_v56 }
 0x5a6   :  { %v2214_v34 = vpop.f32.mrf.mxu3 }
 0x5a7   :  { %2235 = vst.msk [vmem:[%s5636_s4 + $0x70] sm:$0xff] %vm2220_vm10, %v2214_v34 }
 0x5ae   :  { %v2217_v50 = vpop.f32.mrf.mxu3 }
 0x5af   :  { %2236 = vst.msk [vmem:[%s5636_s4 + $0x78] sm:$0xff] %vm2220_vm10, %v2217_v50 }
 0x5b0   :  { %2241 = vsyncpa [#allocation3], 1 }
 0x5b1   :  { %2242 = vsyncpa [#allocation5], 1 }

</bundles_post_ra>
